<compile_context>
chip_gen: v5e
topology: v5e:2x2
jax: 0.10.0
libtpu: 0.0.40
codegen_flags: <defaults>
</compile_context>

<pallas_src>
import math
import functools

import jax
import jax.numpy as jnp
from jax import lax
from jax.experimental import pallas as pl
from jax.experimental.pallas import tpu as pltpu


def _attn_kernel(q_ref, k_ref, v_ref, o_ref, *, scale, tk):
    """Attention for one (head-group, q-tile).

    Block shapes:
      q_ref: (1, G, tq, D)   k_ref/v_ref: (1, G, S, D)  (resident per head group)
      o_ref: (1, tq, G*D)    (lane-dense head-packed output slab)
    """
    q = q_ref[0]                       # (G, tq, D)
    G, tq, D = q.shape
    S = k_ref.shape[2]
    num_kv = S // tk                   # static

    # Fold the 1/sqrt(head_dim) scale into q once (saves a (tq, tk) multiply
    # per kv chunk).
    q = q * jnp.asarray(scale, dtype=q.dtype)

    # Contract D of q against D of k directly (folds the transpose into the
    # MXU contraction); batch over the head-group axis G.
    dn_qk = (((2,), (2,)), ((0,), (0,)))
    dn_pv = (((2,), (1,)), ((0,), (0,)))

    if num_kv == 1:
        # Whole K/V fits in one chunk: plain (non-online) softmax.
        k_all = k_ref[0]               # (G, S, D)
        v_all = v_ref[0]
        s = lax.dot_general(q, k_all, dn_qk,
                            preferred_element_type=jnp.float32)      # (G,tq,S)
        m = s.max(axis=-1, keepdims=True)
        p = jnp.exp(s - m)
        l = p.sum(axis=-1, keepdims=True)
        acc = lax.dot_general(p.astype(v_all.dtype), v_all, dn_pv,
                              preferred_element_type=jnp.float32)    # (G,tq,D)
    else:
        # Online softmax over resident-K/V chunks.
        def body(i, carry):
            m_prev, l_prev, acc_prev = carry
            start = pl.multiple_of(i * tk, tk)
            k_c = k_ref[0, :, pl.ds(start, tk), :]                   # (G,tk,D)
            v_c = v_ref[0, :, pl.ds(start, tk), :]
            s = lax.dot_general(q, k_c, dn_qk,
                                preferred_element_type=jnp.float32)  # (G,tq,tk)
            m_new = jnp.maximum(m_prev, s.max(axis=-1, keepdims=True))
            alpha = jnp.exp(m_prev - m_new)
            p = jnp.exp(s - m_new)
            l_new = alpha * l_prev + p.sum(axis=-1, keepdims=True)
            acc_new = alpha * acc_prev + lax.dot_general(
                p.astype(v_c.dtype), v_c, dn_pv,
                preferred_element_type=jnp.float32)
            return m_new, l_new, acc_new

        m0 = jnp.full((G, tq, 1), -jnp.inf, jnp.float32)
        l0 = jnp.zeros((G, tq, 1), jnp.float32)
        acc0 = jnp.zeros((G, tq, D), jnp.float32)
        _, l, acc = lax.fori_loop(0, num_kv, body, (m0, l0, acc0))

    out = acc * pl.reciprocal(l, approx=True)                        # (G,tq,D)

    # Pack heads onto lanes: (G, tq, D) -> (tq, G*D) so the store is lane-dense.
    if G > 1:
        out_dense = jnp.concatenate([out[g] for g in range(G)], axis=-1)
    else:
        out_dense = out[0]
    o_ref[0] = out_dense.astype(o_ref.dtype)


def attn_pallas(q, k, v, head_dim, *, tq=256, tk=512, mxu_dtype=None):
    """Non-causal scaled dot-product attention (Attn.forward) on TPU.

    q, k, v: [B, H, S, D]. `mxu_dtype=jnp.bfloat16` casts matmul inputs to bf16
    (softmax / accumulation stay f32) — recommended on v6e / v7x.
    """
    B, H, S, D = q.shape
    assert k.shape == (B, H, S, D) and v.shape == (B, H, S, D)
    out_dtype = q.dtype

    if mxu_dtype is not None:
        q = q.astype(mxu_dtype)
        k = k.astype(mxu_dtype)
        v = v.astype(mxu_dtype)

    # Group G heads per grid step so the packed output has G*D (ideally 128)
    # lanes. Pick the largest divisor of H not exceeding 128 // D.
    G = max(1, 128 // D)
    while H % G:
        G -= 1
    NG = (B * H) // G

    tq = min(tq, S)
    tk = min(tk, S)
    # TODO(synk): ragged / non-tile-multiple sequence lengths would need key
    # masking (-inf) before the softmax; not needed for this module's usage.
    assert S % tq == 0 and S % tk == 0, "seq length must divide tile sizes"

    qg = q.reshape(NG, G, S, D)
    kg = k.reshape(NG, G, S, D)
    vg = v.reshape(NG, G, S, D)

    scale = 1.0 / math.sqrt(head_dim)
    kernel = functools.partial(_attn_kernel, scale=scale, tk=tk)

    # Rough VMEM budget: double-buffered q / resident k,v / out blocks plus
    # score intermediates. Only raise the scoped limit if the default would be
    # tight; cap at 64 MiB so the same config is safe on v7x.
    isz = jnp.dtype(qg.dtype).itemsize
    osz = jnp.dtype(out_dtype).itemsize
    vmem_est = (2 * G * tq * D * isz          # q (double buffered)
                + 2 * 2 * G * S * D * isz     # resident k and v
                + 2 * tq * G * D * osz        # output slab
                + 4 * G * tq * tk * 4         # scores / probs intermediates
                + 2 * G * tq * D * 4)         # acc / rescale temporaries
    vmem_limit = None
    if vmem_est > 12 * 1024 * 1024:
        vmem_limit = min(int(vmem_est * 3 // 2), 64 * 1024 * 1024)

    out = pl.pallas_call(
        kernel,
        out_shape=jax.ShapeDtypeStruct((NG, S, G * D), out_dtype),
        grid_spec=pltpu.PrefetchScalarGridSpec(
            num_scalar_prefetch=0,
            grid=(NG, S // tq),
            in_specs=[
                pl.BlockSpec((1, G, tq, D), lambda n, qi: (n, 0, qi, 0)),
                # K/V blocks depend only on n -> DMA'd once per head group.
                pl.BlockSpec((1, G, S, D), lambda n, qi: (n, 0, 0, 0)),
                pl.BlockSpec((1, G, S, D), lambda n, qi: (n, 0, 0, 0)),
            ],
            out_specs=pl.BlockSpec((1, tq, G * D), lambda n, qi: (n, qi, 0)),
        ),
        compiler_params=pltpu.CompilerParams(
            dimension_semantics=("parallel", "parallel"),
            vmem_limit_bytes=vmem_limit),
    )(qg, kg, vg)

    # Unpack heads from lanes: [NG, S, G*D] -> [B, H, S, D] (layout plumbing).
    out = out.reshape(B, H // G, S, G, D)
    out = jnp.transpose(out, (0, 1, 3, 2, 4))
    return out.reshape(B, H, S, D)


def attn_reference(q, k, v, head_dim):
    """Plain-JAX reference matching the PyTorch non-flash branch."""
    s = jnp.einsum("bhqd,bhkd->bhqk", q, k) / math.sqrt(head_dim)
    p = jax.nn.softmax(s, axis=-1)
    return jnp.einsum("bhqk,bhkd->bhqd", p, v)


if __name__ == "__main__":
    # Small shapes consistent with the module's forward: [B, H, S, head_dim]
    B, H, S, D = 2, 4, 128, 32
    head_dim = D  # Attn(head_dim=32, use_flash_attention=False/True)

    key = jax.random.PRNGKey(0)
    kq, kk, kv_ = jax.random.split(key, 3)
    q = jax.random.normal(kq, (B, H, S, D), dtype=jnp.float32)
    k = jax.random.normal(kk, (B, H, S, D), dtype=jnp.float32)
    v = jax.random.normal(kv_, (B, H, S, D), dtype=jnp.float32)

    ref = attn_reference(q, k, v, head_dim)

    # 1) Default config: whole-head resident K/V, single kv chunk, lane-dense out.
    out = jax.block_until_ready(attn_pallas(q, k, v, head_dim))
    assert out.shape == (B, H, S, D)
    err = float(jnp.max(jnp.abs(out - ref)))
    assert jnp.allclose(out, ref, atol=2e-3, rtol=2e-2), (
        f"f32 mismatch vs reference: max abs err = {err}")

    # 2) Multi-chunk path: exercises the in-kernel online-softmax kv loop.
    out2 = jax.block_until_ready(attn_pallas(q, k, v, head_dim, tq=64, tk=32))
    err2 = float(jnp.max(jnp.abs(out2 - ref)))
    assert jnp.allclose(out2, ref, atol=2e-3, rtol=2e-2), (
        f"chunked mismatch vs reference: max abs err = {err2}")

    # 3) bf16 MXU inputs (v6e/v7x recommendation); softmax/accum stay f32.
    out3 = jax.block_until_ready(
        attn_pallas(q, k, v, head_dim, mxu_dtype=jnp.bfloat16))
    err3 = float(jnp.max(jnp.abs(out3 - ref)))
    assert jnp.allclose(out3, ref, atol=5e-2, rtol=5e-2), (
        f"bf16 mismatch vs reference: max abs err = {err3}")

    print("KERNEL_OK")
</pallas_src>

<mosaic_0001>
module attributes {stable_mosaic.version = 11 : i64} {
  func.func @_attn_kernel(%arg0: i32, %arg1: i32, %arg2: memref<1x4x128x32xf32, #tpu.memory_space<vmem>>, %arg3: memref<1x4x128x32xf32, #tpu.memory_space<vmem>>, %arg4: memref<1x4x128x32xf32, #tpu.memory_space<vmem>>, %arg5: memref<1x128x128xf32, #tpu.memory_space<vmem>>) attributes {dimension_semantics = [#tpu.dimension_semantics<parallel>, #tpu.dimension_semantics<parallel>], iteration_bounds = array<i64: 2, 1>, scalar_prefetch = 0 : i64, scratch_operands = 0 : i64, tpu.core_type = #tpu.core_type<tc>, window_params = [{transform_indices = @transform_0, window_bounds = array<i64: 1, 4, 128, 32>}, {transform_indices = @transform_1, window_bounds = array<i64: 1, 4, 128, 32>}, {transform_indices = @transform_2, window_bounds = array<i64: 1, 4, 128, 32>}, {transform_indices = @transform_3, window_bounds = array<i64: 1, 128, 128>}]} {
    %c0 = arith.constant 0 : index
    %c0_0 = arith.constant 0 : index
    %c0_1 = arith.constant 0 : index
    %c0_2 = arith.constant 0 : index
    %0 = vector.load %arg2[%c0, %c0_0, %c0_1, %c0_2] : memref<1x4x128x32xf32, #tpu.memory_space<vmem>>, vector<1x4x128x32xf32>
    %1 = vector.shape_cast %0 : vector<1x4x128x32xf32> to vector<4x128x32xf32>
    %cst = arith.constant 0.176776692 : f32
    %2 = vector.broadcast %cst : f32 to vector<4x128x32xf32>
    %3 = arith.mulf %1, %2 : vector<4x128x32xf32>
    %c0_3 = arith.constant 0 : index
    %c0_4 = arith.constant 0 : index
    %c0_5 = arith.constant 0 : index
    %c0_6 = arith.constant 0 : index
    %4 = vector.load %arg3[%c0_3, %c0_4, %c0_5, %c0_6] : memref<1x4x128x32xf32, #tpu.memory_space<vmem>>, vector<1x4x128x32xf32>
    %5 = vector.shape_cast %4 : vector<1x4x128x32xf32> to vector<4x128x32xf32>
    %c0_7 = arith.constant 0 : index
    %c0_8 = arith.constant 0 : index
    %c0_9 = arith.constant 0 : index
    %c0_10 = arith.constant 0 : index
    %6 = vector.load %arg4[%c0_7, %c0_8, %c0_9, %c0_10] : memref<1x4x128x32xf32, #tpu.memory_space<vmem>>, vector<1x4x128x32xf32>
    %7 = vector.shape_cast %6 : vector<1x4x128x32xf32> to vector<4x128x32xf32>
    %cst_11 = arith.constant dense<0.000000e+00> : vector<4x128x128xf32>
    %8 = tpu.matmul %3, %5, %cst_11 {dimension_numbers = #tpu.dot_dimension_numbers<[2], [2], [1], [1], [0, 0, 0, 1, 1, 1], [0], [0]>} : vector<4x128x32xf32>, vector<4x128x32xf32>, vector<4x128x128xf32> -> vector<4x128x128xf32>
    %cst_12 = arith.constant dense<0xFF800000> : vector<4x128xf32>
    %9 = vector.multi_reduction <maximumf>, %8, %cst_12 [2] : vector<4x128x128xf32> to vector<4x128xf32>
    %10 = vector.shape_cast %9 : vector<4x128xf32> to vector<4x128x1xf32>
    %11 = vector.broadcast %10 : vector<4x128x1xf32> to vector<4x128x128xf32>
    %12 = arith.subf %8, %11 : vector<4x128x128xf32>
    %13 = math.exp %12 : vector<4x128x128xf32>
    %cst_13 = arith.constant dense<0.000000e+00> : vector<4x128xf32>
    %14 = vector.multi_reduction <add>, %13, %cst_13 [2] : vector<4x128x128xf32> to vector<4x128xf32>
    %15 = vector.shape_cast %14 : vector<4x128xf32> to vector<4x128x1xf32>
    %cst_14 = arith.constant dense<0.000000e+00> : vector<4x128x32xf32>
    %16 = tpu.matmul %13, %7, %cst_14 {dimension_numbers = #tpu.dot_dimension_numbers<[2], [1], [1], [2], [0, 0, 0, 1, 1, 2], [0], [0]>} : vector<4x128x128xf32>, vector<4x128x32xf32>, vector<4x128x32xf32> -> vector<4x128x32xf32>
    %17 = tpu.reciprocal %15 {approx = true} : vector<4x128x1xf32> -> vector<4x128x1xf32>
    %18 = vector.broadcast %17 : vector<4x128x1xf32> to vector<4x128x32xf32>
    %19 = arith.mulf %16, %18 : vector<4x128x32xf32>
    %20 = vector.extract_strided_slice %19 {offsets = [0, 0, 0], sizes = [1, 128, 32], strides = [1, 1, 1]} : vector<4x128x32xf32> to vector<1x128x32xf32>
    %21 = vector.shape_cast %20 : vector<1x128x32xf32> to vector<128x32xf32>
    %22 = vector.extract_strided_slice %19 {offsets = [1, 0, 0], sizes = [1, 128, 32], strides = [1, 1, 1]} : vector<4x128x32xf32> to vector<1x128x32xf32>
    %23 = vector.shape_cast %22 : vector<1x128x32xf32> to vector<128x32xf32>
    %24 = vector.extract_strided_slice %19 {offsets = [2, 0, 0], sizes = [1, 128, 32], strides = [1, 1, 1]} : vector<4x128x32xf32> to vector<1x128x32xf32>
    %25 = vector.shape_cast %24 : vector<1x128x32xf32> to vector<128x32xf32>
    %26 = vector.extract_strided_slice %19 {offsets = [3, 0, 0], sizes = [1, 128, 32], strides = [1, 1, 1]} : vector<4x128x32xf32> to vector<1x128x32xf32>
    %27 = vector.shape_cast %26 : vector<1x128x32xf32> to vector<128x32xf32>
    %28 = tpu.concatenate %21, %23, %25, %27 in 1 : vector<128x32xf32>, vector<128x32xf32>, vector<128x32xf32>, vector<128x32xf32> -> vector<128x128xf32>
    %c0_15 = arith.constant 0 : index
    %c0_16 = arith.constant 0 : index
    %c0_17 = arith.constant 0 : index
    %29 = vector.load %arg5[%c0_15, %c0_16, %c0_17] : memref<1x128x128xf32, #tpu.memory_space<vmem>>, vector<1x128x128xf32>
    %30 = vector.shape_cast %29 : vector<1x128x128xf32> to vector<128x128xf32>
    %31 = vector.shape_cast %28 : vector<128x128xf32> to vector<1x128x128xf32>
    tpu.vector_store %arg5[%c0_15, %c0_16, %c0_17], %31 {strides = array<i32>} : memref<1x128x128xf32, #tpu.memory_space<vmem>>, vector<1x128x128xf32>,
    return
  }
  func.func @transform_0(%arg0: i32, %arg1: i32) -> (i32, i32, i32, i32) {
    %c0_i32 = arith.constant 0 : i32
    %c0_i32_0 = arith.constant 0 : i32
    %c0_i32_1 = arith.constant 0 : i32
    return %arg0, %c0_i32, %arg1, %c0_i32_0 : i32, i32, i32, i32
  }
  func.func @transform_1(%arg0: i32, %arg1: i32) -> (i32, i32, i32, i32) {
    %c0_i32 = arith.constant 0 : i32
    %c0_i32_0 = arith.constant 0 : i32
    %c0_i32_1 = arith.constant 0 : i32
    %c0_i32_2 = arith.constant 0 : i32
    return %arg0, %c0_i32, %c0_i32_0, %c0_i32_1 : i32, i32, i32, i32
  }
  func.func @transform_2(%arg0: i32, %arg1: i32) -> (i32, i32, i32, i32) {
    %c0_i32 = arith.constant 0 : i32
    %c0_i32_0 = arith.constant 0 : i32
    %c0_i32_1 = arith.constant 0 : i32
    %c0_i32_2 = arith.constant 0 : i32
    return %arg0, %c0_i32, %c0_i32_0, %c0_i32_1 : i32, i32, i32, i32
  }
  func.func @transform_3(%arg0: i32, %arg1: i32) -> (i32, i32, i32) {
    %c0_i32 = arith.constant 0 : i32
    %c0_i32_0 = arith.constant 0 : i32
    return %arg0, %arg1, %c0_i32 : i32, i32, i32
  }
}

</mosaic_0001>

<bundles_post_ra>
// kernel: tpu_custom_call.1
= control target key start
LH: loop header
LB: loop body
LE: loop exit
PB: predicated region body
PF: predicated region fallthrough
CT: control target
= control target key end

     0   :  { %8 = vsyncpa [#allocation3], 0  ;;  %s4112_s0 = inlined_call_operand.vmem [shape: f32[2,4,128,32], index: 0, kind: input, shape index: {}]   ;;  %s4113_s1 = inlined_call_operand.vmem [shape: f32[2,4,128,32], index: 1, kind: input, shape index: {}]   ;;  %s4114_s2 = inlined_call_operand.vmem [shape: f32[2,4,128,32], index: 2, kind: input, shape index: {}]   ;;  %s4115_s3 = inlined_call_operand.hbm [shape: f32[2,128,128], index: 3, kind: output, shape index: {}]  }
   0x1   :  { %10 = vsyncpa [#allocation3 + $0x1], 0  ;;  %s2926_s12 = smov 0   ;;  %s2928_s13 = smov 0  }
   0x2   :  { %s2930_s14 = smov 0   ;;  %s2932_s15 = smov 0  }
   0x3   :  { %s2934_s16 = smov 0   ;;  %s2936_s17 = smov 0  }
   0x4 LB: > { %s2356_s18 = sadd.s32 4294967295, %s2899_s17   ;;  %s2357_s19 = sadd.s32 4294967294, %s2899_s17   ;;  %s2899_s17 = sphi %s2936_s17, %s16_s17   ;;  %s2895_s16 = sphi %s2934_s16, %s4146_s16   ;;  %s2891_s15 = sphi %s2932_s15, %s4145_s15   ;;  %s2887_s14 = sphi %s2930_s14, %s4144_s14   ;;  %s2883_s13 = sphi %s2928_s13, %s4143_s13   ;;  %s2879_s12 = sphi %s2926_s12, %s4142_s12  }
   0x5   : > { %s28_s20 = sadd.s32 1, %s2895_s16  ;;  %s117_s21 = sadd.s32 1, %s2887_s14 }
   0x6   : > { %p30_p0 = scmp.ge.s32.totalorder %s28_s20, 2  ;;  %p127_p1 = scmp.ne.s32.totalorder %s2887_s14, %s2883_s13 }
   0x7   : > { %p128_p2 = scmp.eq.s32.totalorder %s2356_s18, 1  ;;  %p133_p3 = scmp.ne.s32.totalorder %s2883_s13, %s2879_s12 }
   0x8   : > { %s4148_s20 = smov (%p30_p0, %s28_s20), 0  ;;  %p134_p5 = scmp.eq.s32.totalorder %s2357_s19, 1 }
   0x9   : > { %p2966_p4 = por %p128_p2, %p127_p1  ;;  %s112_s23 = ssub.s32 %s2895_s16, %s4148_s20 }
   0xa   : > { %p2360_p6 = scmp.ge.s32.totalorder %s2899_s17, 1  ;;  %p115_p7 = scmp.eq.s32.totalorder %s112_s23, 0 }
   0xb   : > { %p2973_p8 = por %p134_p5, %p133_p3  ;;  %p181_p9 = scmp.lt.s32.totalorder %s2899_s17, 3 }
   0xc   : > { %s2979_s25 = scalar_select %p115_p7, %s2887_s14, %s117_s21  }
   0xd   : > { %p182_p10 = pnand %p2360_p6, %p181_p9 }
   0xf   : > { %185 = sbr.rel (%p182_p10) target bundleno = 819 (0x333), region = 32 }
  0x14   : > { %p220_p11 = scmp.lt.s32.totalorder %s2891_s15, 1  ;;  %vm496_vm0 = vcmask 261120   ;;  %s2901_s10 = smov 32   ;;  %vm2202_vm1 = vcmask 785408   ;;  %vm2185_vm2 = vcmask 523264  }
  0x15   : > { %s2902_s11 = smov 64   ;;  %s2903_s18 = smov 96  }
  0x16   : > { %s221_s26 = scalar_select %p220_p11, %s2891_s15, 1 }
  0x17   : > { %s216_s19 = sand.u32 1, %s2883_s13  }
  0x18   : > { %s2983_s27 = sshll.u32 %s221_s26, 9  ;;  %s2361_s21 = sshll.u32 %s216_s19, 7 }
  0x19   : > { %s2989_s30 = scalar_lea.vmem %s4113_s1, %s2983_s27  ;;  %s3109_s6 = scalar_lea.vmem %s4112_s0, %s2983_s27 }
  0x1a   : > { %v383_v0 = vld [vmem:[%s2989_s30 + $0x78] sm:$0xff]  ;;  %v382_v4 = vld [vmem:[%s2989_s30 + $0x70] sm:$0xff]  ;;  %v381_v8 = vld [vmem:[%s2989_s30 + $0x68] sm:$0xff]  ;;  %s3318_s9 = scalar_lea.vmem %s4114_s2, %s2983_s27  ;;  %s3994_s23 = scalar_lea.vmem [#allocation2], %s2361_s21 }
  0x1b   : > { %v399_v1 = vld [vmem:[%s2989_s30 + $0xf8] sm:$0xff]  ;;  %2368 = vmatpush.xpose.msk.msra.mxu0 %vm496_vm0, %v383_v0  ;;  %v398_v5 = vld [vmem:[%s2989_s30 + $0xf0] sm:$0xff]  ;;  %v397_v9 = vld [vmem:[%s2989_s30 + $0xe8] sm:$0xff]  ;;  %s2504_s26 = sshll.u32 %s2891_s15, 7  ;;  %s2250_s15 = sshll.u32 %s3994_s23, 4  ;;  %s2251_s15 = int_to_ptr.vmem [resolvable:$true] %s2250_s15 }
  0x1c   : > { %v415_v2 = vld [vmem:[%s2989_s30 + $0x178] sm:$0xff]  ;;  %2400 = vmatpush.xpose.msk.msra.mxu1 %vm496_vm0, %v399_v1  ;;  %v414_v6 = vld [vmem:[%s2989_s30 + $0x170] sm:$0xff]  ;;  %v413_v10 = vld [vmem:[%s2989_s30 + $0x168] sm:$0xff]  ;;  %s2249_s29 = scalar_lea.hbm %s4115_s3, %s2504_s26  ;;  %s2236_s4 = scalar_lea.sflag [#allocation3], %s216_s19 }
  0x1d   : > { %v431_v3 = vld [vmem:[%s2989_s30 + $0x1f8] sm:$0xff]  ;;  %2432 = vmatpush.xpose.msk.msra.mxu2 %vm496_vm0, %v415_v2  ;;  %v430_v7 = vld [vmem:[%s2989_s30 + $0x1f0] sm:$0xff]  ;;  %v429_v11 = vld [vmem:[%s2989_s30 + $0x1e8] sm:$0xff] }
  0x1e   : > { %2464 = vmatpush.xpose.msk.msra.mxu3 %vm496_vm0, %v431_v3  ;;  %v380_v12 = vld [vmem:[%s2989_s30 + $0x60] sm:$0xff]  ;;  %v379_v16 = vld [vmem:[%s2989_s30 + $0x58] sm:$0xff]  ;;  %v378_v20 = vld [vmem:[%s2989_s30 + $0x50] sm:$0xff] }
  0x1f   : > { %2369 = vmatpush.xpose.msk.msra.mxu0 %vm496_vm0, %v382_v4  ;;  %v396_v13 = vld [vmem:[%s2989_s30 + $0xe0] sm:$0xff]  ;;  %v395_v17 = vld [vmem:[%s2989_s30 + $0xd8] sm:$0xff]  ;;  %v394_v21 = vld [vmem:[%s2989_s30 + $0xd0] sm:$0xff] }
  0x20   : > { %2401 = vmatpush.xpose.msk.msra.mxu1 %vm496_vm0, %v398_v5  ;;  %v412_v14 = vld [vmem:[%s2989_s30 + $0x160] sm:$0xff]  ;;  %v411_v18 = vld [vmem:[%s2989_s30 + $0x158] sm:$0xff]  ;;  %v410_v22 = vld [vmem:[%s2989_s30 + $0x150] sm:$0xff] }
  0x21   : > { %2433 = vmatpush.xpose.msk.msra.mxu2 %vm496_vm0, %v414_v6  ;;  %v428_v15 = vld [vmem:[%s2989_s30 + $0x1e0] sm:$0xff]  ;;  %v427_v19 = vld [vmem:[%s2989_s30 + $0x1d8] sm:$0xff]  ;;  %v426_v23 = vld [vmem:[%s2989_s30 + $0x1d0] sm:$0xff] }
  0x22   : > { %2465 = vmatpush.xpose.msk.msra.mxu3 %vm496_vm0, %v430_v7  ;;  %v377_v24 = vld [vmem:[%s2989_s30 + $0x48] sm:$0xff]  ;;  %v376_v28 = vld [vmem:[%s2989_s30 + $0x40] sm:$0xff]  ;;  %v375_v32 = vld [vmem:[%s2989_s30 + $0x38] sm:$0xff] }
  0x23   : > { %2370 = vmatpush.xpose.msk.msra.mxu0 %vm496_vm0, %v381_v8  ;;  %v393_v25 = vld [vmem:[%s2989_s30 + $0xc8] sm:$0xff]  ;;  %v392_v29 = vld [vmem:[%s2989_s30 + $0xc0] sm:$0xff]  ;;  %v391_v33 = vld [vmem:[%s2989_s30 + $0xb8] sm:$0xff] }
  0x24   : > { %2402 = vmatpush.xpose.msk.msra.mxu1 %vm496_vm0, %v397_v9  ;;  %v409_v26 = vld [vmem:[%s2989_s30 + $0x148] sm:$0xff]  ;;  %v408_v30 = vld [vmem:[%s2989_s30 + $0x140] sm:$0xff]  ;;  %v407_v34 = vld [vmem:[%s2989_s30 + $0x138] sm:$0xff] }
  0x25   : > { %2434 = vmatpush.xpose.msk.msra.mxu2 %vm496_vm0, %v413_v10  ;;  %v425_v27 = vld [vmem:[%s2989_s30 + $0x1c8] sm:$0xff]  ;;  %v424_v31 = vld [vmem:[%s2989_s30 + $0x1c0] sm:$0xff]  ;;  %v423_v35 = vld [vmem:[%s2989_s30 + $0x1b8] sm:$0xff] }
  0x26   : > { %2466 = vmatpush.xpose.msk.msra.mxu3 %vm496_vm0, %v429_v11  ;;  %v374_v36 = vld [vmem:[%s2989_s30 + $0x30] sm:$0xff]  ;;  %v373_v40 = vld [vmem:[%s2989_s30 + $0x28] sm:$0xff]  ;;  %v372_v44 = vld [vmem:[%s2989_s30 + $0x20] sm:$0xff] }
  0x27   : > { %2371 = vmatpush.xpose.msk.msra.mxu0 %vm496_vm0, %v380_v12  ;;  %v390_v37 = vld [vmem:[%s2989_s30 + $0xb0] sm:$0xff]  ;;  %v389_v41 = vld [vmem:[%s2989_s30 + $0xa8] sm:$0xff]  ;;  %v388_v45 = vld [vmem:[%s2989_s30 + $0xa0] sm:$0xff] }
  0x28   : > { %2403 = vmatpush.xpose.msk.msra.mxu1 %vm496_vm0, %v396_v13  ;;  %v406_v38 = vld [vmem:[%s2989_s30 + $0x130] sm:$0xff]  ;;  %v405_v42 = vld [vmem:[%s2989_s30 + $0x128] sm:$0xff]  ;;  %v404_v46 = vld [vmem:[%s2989_s30 + $0x120] sm:$0xff] }
  0x29   : > { %2435 = vmatpush.xpose.msk.msra.mxu2 %vm496_vm0, %v412_v14  ;;  %v422_v39 = vld [vmem:[%s2989_s30 + $0x1b0] sm:$0xff]  ;;  %v421_v43 = vld [vmem:[%s2989_s30 + $0x1a8] sm:$0xff]  ;;  %v420_v47 = vld [vmem:[%s2989_s30 + $0x1a0] sm:$0xff] }
  0x2a   : > { %2467 = vmatpush.xpose.msk.msra.mxu3 %vm496_vm0, %v428_v15  ;;  %v371_v48 = vld [vmem:[%s2989_s30 + $0x18] sm:$0xff]  ;;  %v370_v52 = vld [vmem:[%s2989_s30 + $0x10] sm:$0xff]  ;;  %v369_v56 = vld [vmem:[%s2989_s30 + $0x8] sm:$0xff] }
  0x2b   : > { %2372 = vmatpush.xpose.msk.msra.mxu0 %vm496_vm0, %v379_v16  ;;  %v387_v49 = vld [vmem:[%s2989_s30 + $0x98] sm:$0xff]  ;;  %v386_v53 = vld [vmem:[%s2989_s30 + $0x90] sm:$0xff]  ;;  %v385_v57 = vld [vmem:[%s2989_s30 + $0x88] sm:$0xff] }
  0x2c   : > { %2404 = vmatpush.xpose.msk.msra.mxu1 %vm496_vm0, %v395_v17  ;;  %v403_v50 = vld [vmem:[%s2989_s30 + $0x118] sm:$0xff]  ;;  %v402_v54 = vld [vmem:[%s2989_s30 + $0x110] sm:$0xff]  ;;  %v401_v58 = vld [vmem:[%s2989_s30 + $0x108] sm:$0xff] }
  0x2d   : > { %2436 = vmatpush.xpose.msk.msra.mxu2 %vm496_vm0, %v411_v18  ;;  %v419_v51 = vld [vmem:[%s2989_s30 + $0x198] sm:$0xff]  ;;  %v418_v55 = vld [vmem:[%s2989_s30 + $0x190] sm:$0xff]  ;;  %v417_v59 = vld [vmem:[%s2989_s30 + $0x188] sm:$0xff] }
  0x2e   : > { %2468 = vmatpush.xpose.msk.msra.mxu3 %vm496_vm0, %v427_v19  ;;  %v368_v60 = vld [vmem:[%s2989_s30] sm:$0xff]  ;;  %v241_v8 = vld [vmem:[%s3109_s6 + $0x8] sm:$0xff]  ;;  %v242_v16 = vld [vmem:[%s3109_s6 + $0x10] sm:$0xff] }
  0x2f   : > { %2373 = vmatpush.xpose.msk.msra.mxu0 %vm496_vm0, %v378_v20  ;;  %v240_v61 = vld [vmem:[%s3109_s6] sm:$0xff]  ;;  %v257_v9 = vld [vmem:[%s3109_s6 + $0x88] sm:$0xff]  ;;  %v305_v12 = vmul.f32 0.17677669, %v241_v8  ;;  %v258_v17 = vld [vmem:[%s3109_s6 + $0x90] sm:$0xff] }
  0x30   : > { %2405 = vmatpush.xpose.msk.msra.mxu1 %vm496_vm0, %v394_v21  ;;  %v256_v62 = vld [vmem:[%s3109_s6 + $0x80] sm:$0xff]  ;;  %v304_v4 = vmul.f32 0.17677669, %v240_v61  ;;  %v273_v10 = vld [vmem:[%s3109_s6 + $0x108] sm:$0xff]  ;;  %v321_v13 = vmul.f32 0.17677669, %v257_v9 }
  0x31   : > { %2437 = vmatpush.xpose.msk.msra.mxu2 %vm496_vm0, %v410_v22  ;;  %v384_v63 = vld [vmem:[%s2989_s30 + $0x80] sm:$0xff]  ;;  %v320_v5 = vmul.f32 0.17677669, %v256_v62  ;;  %v289_v11 = vld [vmem:[%s3109_s6 + $0x188] sm:$0xff]  ;;  %v337_v14 = vmul.f32 0.17677669, %v273_v10 }
  0x32   : > { %2469 = vmatpush.xpose.msk.msra.mxu3 %vm496_vm0, %v426_v23  ;;  %v272_v0 = vld [vmem:[%s3109_s6 + $0x100] sm:$0xff]  ;;  %v353_v15 = vmul.f32 0.17677669, %v289_v11  ;;  %v274_v18 = vld [vmem:[%s3109_s6 + $0x110] sm:$0xff]  ;;  %v306_v20 = vmul.f32 0.17677669, %v242_v16 }
  0x33   : > { %2374 = vmatpush.xpose.msk.msra.mxu0 %vm496_vm0, %v377_v24  ;;  %v288_v1 = vld [vmem:[%s3109_s6 + $0x180] sm:$0xff]  ;;  %v336_v6 = vmul.f32 0.17677669, %v272_v0  ;;  %v290_v19 = vld [vmem:[%s3109_s6 + $0x190] sm:$0xff]  ;;  %v322_v21 = vmul.f32 0.17677669, %v258_v17 }
  0x34   : > { %2406 = vmatpush.xpose.msk.msra.mxu1 %vm496_vm0, %v393_v25  ;;  %v400_v2 = vld [vmem:[%s2989_s30 + $0x100] sm:$0xff]  ;;  %v352_v7 = vmul.f32 0.17677669, %v288_v1  ;;  %v338_v22 = vmul.f32 0.17677669, %v274_v18  ;;  %v243_v24 = vld [vmem:[%s3109_s6 + $0x18] sm:$0xff] }
  0x35   : > { %2438 = vmatpush.xpose.msk.msra.mxu2 %vm496_vm0, %v409_v26  ;;  %v416_v3 = vld [vmem:[%s2989_s30 + $0x180] sm:$0xff]  ;;  %v354_v23 = vmul.f32 0.17677669, %v290_v19  ;;  %v259_v25 = vld [vmem:[%s3109_s6 + $0x98] sm:$0xff]  ;;  %v249_v8 = vld [vmem:[%s3109_s6 + $0x48] sm:$0xff]  ;;  %s2252_s30 = sshll.u32 %s2249_s29, 4  ;;  %s2253_s30 = int_to_ptr.hbm [resolvable:$true] %s2252_s30 }
  0x36   : > { %2470 = vmatpush.xpose.msk.msra.mxu3 %vm496_vm0, %v425_v27  ;;  %v275_v26 = vld [vmem:[%s3109_s6 + $0x118] sm:$0xff]  ;;  %v248_v0 = vld [vmem:[%s3109_s6 + $0x40] sm:$0xff]  ;;  %v265_v9 = vld [vmem:[%s3109_s6 + $0xc8] sm:$0xff]  ;;  %s2835_s5 = sshra.s32 %s2253_s30, 4  ;;  %s2836_s5 = int_to_ptr.hbm [resolvable:$true] %s2835_s5 }
  0x37   : > { %2375 = vmatpush.xpose.msk.msra.mxu0 %vm496_vm0, %v376_v28  ;;  %v291_v27 = vld [vmem:[%s3109_s6 + $0x198] sm:$0xff]  ;;  %v307_v28 = vmul.f32 0.17677669, %v243_v24  ;;  %v264_v1 = vld [vmem:[%s3109_s6 + $0xc0] sm:$0xff]  ;;  %v281_v10 = vld [vmem:[%s3109_s6 + $0x148] sm:$0xff]  ;;  %p2842_p1 = scmp.lt.s32.totalorder %s2836_s5, %s4115_s3 }
  0x38   : > { %2407 = vmatpush.xpose.msk.msra.mxu1 %vm496_vm0, %v392_v29  ;;  %v323_v29 = vmul.f32 0.17677669, %v259_v25  ;;  %v297_v11 = vld [vmem:[%s3109_s6 + $0x1c8] sm:$0xff]  ;;  %v250_v16 = vld [vmem:[%s3109_s6 + $0x50] sm:$0xff]  ;;  %v251_v24 = vld [vmem:[%s3109_s6 + $0x58] sm:$0xff] }
  0x39   : > { %2439 = vmatpush.xpose.msk.msra.mxu2 %vm496_vm0, %v408_v30  ;;  %v339_v30 = vmul.f32 0.17677669, %v275_v26  ;;  %v266_v17 = vld [vmem:[%s3109_s6 + $0xd0] sm:$0xff]  ;;  %v267_v25 = vld [vmem:[%s3109_s6 + $0xd8] sm:$0xff] }
  0x3a   : > { %2471 = vmatpush.xpose.msk.msra.mxu3 %vm496_vm0, %v424_v31  ;;  %v355_v31 = vmul.f32 0.17677669, %v291_v27  ;;  %v282_v18 = vld [vmem:[%s3109_s6 + $0x150] sm:$0xff]  ;;  %v283_v26 = vld [vmem:[%s3109_s6 + $0x158] sm:$0xff] }
  0x3b   : > { %2376 = vmatpush.xpose.msk.msra.mxu0 %vm496_vm0, %v375_v32  ;;  %v244_v32 = vld [vmem:[%s3109_s6 + $0x20] sm:$0xff]  ;;  %v298_v19 = vld [vmem:[%s3109_s6 + $0x1d0] sm:$0xff]  ;;  %v299_v27 = vld [vmem:[%s3109_s6 + $0x1d8] sm:$0xff] }
  0x3c   : > { %2408 = vmatpush.xpose.msk.msra.mxu1 %vm496_vm0, %v391_v33  ;;  %v260_v33 = vld [vmem:[%s3109_s6 + $0xa0] sm:$0xff] }
  0x3d   : > { %2440 = vmatpush.xpose.msk.msra.mxu2 %vm496_vm0, %v407_v34  ;;  %v276_v34 = vld [vmem:[%s3109_s6 + $0x120] sm:$0xff] }
  0x3e   : > { %2472 = vmatpush.xpose.msk.msra.mxu3 %vm496_vm0, %v423_v35  ;;  %v292_v35 = vld [vmem:[%s3109_s6 + $0x1a0] sm:$0xff] }
  0x3f   : > { %2377 = vmatpush.xpose.msk.msra.mxu0 %vm496_vm0, %v374_v36  ;;  %v308_v36 = vmul.f32 0.17677669, %v244_v32  ;;  %v252_v32 = vld [vmem:[%s3109_s6 + $0x60] sm:$0xff] }
  0x40   : > { %2409 = vmatpush.xpose.msk.msra.mxu1 %vm496_vm0, %v390_v37  ;;  %v324_v37 = vmul.f32 0.17677669, %v260_v33  ;;  %v284_v33 = vld [vmem:[%s3109_s6 + $0x160] sm:$0xff] }
  0x41   : > { %2441 = vmatpush.xpose.msk.msra.mxu2 %vm496_vm0, %v406_v38  ;;  %v340_v38 = vmul.f32 0.17677669, %v276_v34  ;;  %v300_v34 = vld [vmem:[%s3109_s6 + $0x1e0] sm:$0xff] }
  0x42   : > { %2473 = vmatpush.xpose.msk.msra.mxu3 %vm496_vm0, %v422_v39  ;;  %v356_v39 = vmul.f32 0.17677669, %v292_v35  ;;  %v316_v35 = vmul.f32 0.17677669, %v252_v32  ;;  %v461_v32 = vld [vmem:[%s3318_s9 + $0xe8] sm:$0xff] }
  0x43   : > { %2378 = vmatpush.xpose.msk.msra.mxu0 %vm496_vm0, %v373_v40  ;;  %v245_v40 = vld [vmem:[%s3109_s6 + $0x28] sm:$0xff] }
  0x44   : > { %2410 = vmatpush.xpose.msk.msra.mxu1 %vm496_vm0, %v389_v41  ;;  %v261_v41 = vld [vmem:[%s3109_s6 + $0xa8] sm:$0xff] }
  0x45   : > { %2442 = vmatpush.xpose.msk.msra.mxu2 %vm496_vm0, %v405_v42  ;;  %v277_v42 = vld [vmem:[%s3109_s6 + $0x128] sm:$0xff] }
  0x46   : > { %2474 = vmatpush.xpose.msk.msra.mxu3 %vm496_vm0, %v421_v43  ;;  %v293_v43 = vld [vmem:[%s3109_s6 + $0x1a8] sm:$0xff] }
  0x47   : > { %2379 = vmatpush.xpose.msk.msra.mxu0 %vm496_vm0, %v372_v44  ;;  %v309_v44 = vmul.f32 0.17677669, %v245_v40  ;;  %v285_v40 = vld [vmem:[%s3109_s6 + $0x168] sm:$0xff] }
  0x48   : > { %2411 = vmatpush.xpose.msk.msra.mxu1 %vm496_vm0, %v388_v45  ;;  %v325_v45 = vmul.f32 0.17677669, %v261_v41  ;;  %v349_v41 = vmul.f32 0.17677669, %v285_v40  ;;  %v459_v40 = vld [vmem:[%s3318_s9 + $0xd8] sm:$0xff] }
  0x49   : > { %2443 = vmatpush.xpose.msk.msra.mxu2 %vm496_vm0, %v404_v46  ;;  %v341_v46 = vmul.f32 0.17677669, %v277_v42  ;;  %v253_v42 = vld [vmem:[%s3109_s6 + $0x68] sm:$0xff] }
  0x4a   : > { %2475 = vmatpush.xpose.msk.msra.mxu3 %vm496_vm0, %v420_v47  ;;  %v357_v47 = vmul.f32 0.17677669, %v293_v43  ;;  %v269_v43 = vld [vmem:[%s3109_s6 + $0xe8] sm:$0xff] }
  0x4b   : > { %2380 = vmatpush.xpose.msk.msra.mxu0 %vm496_vm0, %v371_v48  ;;  %v246_v48 = vld [vmem:[%s3109_s6 + $0x30] sm:$0xff] }
  0x4c   : > { %2412 = vmatpush.xpose.msk.msra.mxu1 %vm496_vm0, %v387_v49  ;;  %v262_v49 = vld [vmem:[%s3109_s6 + $0xb0] sm:$0xff] }
  0x4d   : > { %2444 = vmatpush.xpose.msk.msra.mxu2 %vm496_vm0, %v403_v50  ;;  %v278_v50 = vld [vmem:[%s3109_s6 + $0x130] sm:$0xff] }
  0x4e   : > { %2476 = vmatpush.xpose.msk.msra.mxu3 %vm496_vm0, %v419_v51  ;;  %v294_v51 = vld [vmem:[%s3109_s6 + $0x1b0] sm:$0xff] }
  0x4f   : > { %2381 = vmatpush.xpose.msk.msra.mxu0 %vm496_vm0, %v370_v52  ;;  %v310_v52 = vmul.f32 0.17677669, %v246_v48  ;;  %v254_v48 = vld [vmem:[%s3109_s6 + $0x70] sm:$0xff] }
  0x50   : > { %2413 = vmatpush.xpose.msk.msra.mxu1 %vm496_vm0, %v386_v53  ;;  %v326_v53 = vmul.f32 0.17677669, %v262_v49  ;;  %v318_v49 = vmul.f32 0.17677669, %v254_v48  ;;  %v493_v48 = vld [vmem:[%s3318_s9 + $0x1e8] sm:$0xff] }
  0x51   : > { %2445 = vmatpush.xpose.msk.msra.mxu2 %vm496_vm0, %v402_v54  ;;  %v342_v54 = vmul.f32 0.17677669, %v278_v50  ;;  %v270_v50 = vld [vmem:[%s3109_s6 + $0xf0] sm:$0xff] }
  0x52   : > { %2477 = vmatpush.xpose.msk.msra.mxu3 %vm496_vm0, %v418_v55  ;;  %v358_v55 = vmul.f32 0.17677669, %v294_v51  ;;  %v286_v51 = vld [vmem:[%s3109_s6 + $0x170] sm:$0xff] }
  0x53   : > { %2382 = vmatpush.xpose.msk.msra.mxu0 %vm496_vm0, %v369_v56  ;;  %v247_v56 = vld [vmem:[%s3109_s6 + $0x38] sm:$0xff] }
  0x54   : > { %2414 = vmatpush.xpose.msk.msra.mxu1 %vm496_vm0, %v385_v57  ;;  %v263_v57 = vld [vmem:[%s3109_s6 + $0xb8] sm:$0xff] }
  0x55   : > { %2446 = vmatpush.xpose.msk.msra.mxu2 %vm496_vm0, %v401_v58  ;;  %v279_v58 = vld [vmem:[%s3109_s6 + $0x138] sm:$0xff]  ;;  %v327_v61 = vmul.f32 0.17677669, %v263_v57 }
  0x56   : > { %2478 = vmatpush.xpose.msk.msra.mxu3 %vm496_vm0, %v417_v59  ;;  %v295_v59 = vld [vmem:[%s3109_s6 + $0x1b8] sm:$0xff]  ;;  %v343_v62 = vmul.f32 0.17677669, %v279_v58 }
  0x57   : > { %2383 = vmatpush.xpose.msk.msra.mxu0 %vm496_vm0, %v368_v60  ;;  %v311_v60 = vmul.f32 0.17677669, %v247_v56  ;;  %v255_v58 = vld [vmem:[%s3109_s6 + $0x78] sm:$0xff] }
  0x58   : > { %2415 = vmatpush.xpose.msk.msra.mxu1 %vm496_vm0, %v384_v63  ;;  %v359_v63 = vmul.f32 0.17677669, %v295_v59  ;;  %v287_v59 = vld [vmem:[%s3109_s6 + $0x178] sm:$0xff] }
  0x59   : > { %2447 = vmatpush.xpose.msk.msra.mxu2 %vm496_vm0, %v400_v2  ;;  %v280_v2 = vld [vmem:[%s3109_s6 + $0x140] sm:$0xff] }
  0x5a   : > { %2479 = vmatpush.xpose.msk.msra.mxu3 %vm496_vm0, %v416_v3  ;;  %2384 = vmatmul.msk.f32.vlgmr.msra.gmra.mxu0 %vm496_vm0, %v304_v4  ;;  %v296_v3 = vld [vmem:[%s3109_s6 + $0x1c0] sm:$0xff]  ;;  %v312_v4 = vmul.f32 0.17677669, %v248_v0 }
  0x5b   : > { %2416 = vmatmul.msk.f32.vlgmr.msra.gmra.mxu1 %vm496_vm0, %v320_v5  ;;  %v328_v5 = vmul.f32 0.17677669, %v264_v1 }
  0x5c   : > { %2448 = vmatmul.msk.f32.vlgmr.msra.gmra.mxu2 %vm496_vm0, %v336_v6  ;;  %v344_v6 = vmul.f32 0.17677669, %v280_v2  ;;  %v271_v2 = vld [vmem:[%s3109_s6 + $0xf8] sm:$0xff] }
  0x5d   : > { %2480 = vmatmul.msk.f32.vlgmr.msra.gmra.mxu3 %vm496_vm0, %v352_v7  ;;  %v360_v7 = vmul.f32 0.17677669, %v296_v3 }
  0x62   : > { %2385 = vmatmul.msk.f32.gmra.mxu0 %vm496_vm0, %v305_v12  ;;  %v313_v12 = vmul.f32 0.17677669, %v249_v8 }
  0x63   : > { %2417 = vmatmul.msk.f32.gmra.mxu1 %vm496_vm0, %v321_v13  ;;  %v329_v13 = vmul.f32 0.17677669, %v265_v9 }
  0x64   : > { %2449 = vmatmul.msk.f32.gmra.mxu2 %vm496_vm0, %v337_v14  ;;  %v345_v14 = vmul.f32 0.17677669, %v281_v10 }
  0x65   : > { %2481 = vmatmul.msk.f32.gmra.mxu3 %vm496_vm0, %v353_v15  ;;  %v361_v15 = vmul.f32 0.17677669, %v297_v11 }
  0x6a   : > { %2386 = vmatmul.msk.f32.gmra.mxu0 %vm496_vm0, %v306_v20  ;;  %v314_v20 = vmul.f32 0.17677669, %v250_v16 }
  0x6b   : > { %2418 = vmatmul.msk.f32.gmra.mxu1 %vm496_vm0, %v322_v21  ;;  %v330_v21 = vmul.f32 0.17677669, %v266_v17 }
  0x6c   : > { %2450 = vmatmul.msk.f32.gmra.mxu2 %vm496_vm0, %v338_v22  ;;  %v346_v22 = vmul.f32 0.17677669, %v282_v18 }
  0x6d   : > { %2482 = vmatmul.msk.f32.gmra.mxu3 %vm496_vm0, %v354_v23  ;;  %v362_v23 = vmul.f32 0.17677669, %v298_v19 }
  0x72   : > { %2387 = vmatmul.msk.f32.gmra.mxu0 %vm496_vm0, %v307_v28  ;;  %v315_v28 = vmul.f32 0.17677669, %v251_v24 }
  0x73   : > { %2419 = vmatmul.msk.f32.gmra.mxu1 %vm496_vm0, %v323_v29  ;;  %v331_v29 = vmul.f32 0.17677669, %v267_v25 }
  0x74   : > { %2451 = vmatmul.msk.f32.gmra.mxu2 %vm496_vm0, %v339_v30  ;;  %v347_v30 = vmul.f32 0.17677669, %v283_v26 }
  0x75   : > { %2483 = vmatmul.msk.f32.gmra.mxu3 %vm496_vm0, %v355_v31  ;;  %v363_v31 = vmul.f32 0.17677669, %v299_v27  ;;  %v462_v27 = vld [vmem:[%s3318_s9 + $0xf0] sm:$0xff] }
  0x7a   : > { %2388 = vmatmul.msk.f32.gmra.mxu0 %vm496_vm0, %v308_v36  ;;  %v348_v36 = vmul.f32 0.17677669, %v284_v33 }
  0x7b   : > { %2420 = vmatmul.msk.f32.gmra.mxu1 %vm496_vm0, %v324_v37  ;;  %v364_v37 = vmul.f32 0.17677669, %v300_v34  ;;  %v445_v34 = vld [vmem:[%s3318_s9 + $0x68] sm:$0xff] }
  0x7c   : > { %2452 = vmatmul.msk.f32.gmra.mxu2 %vm496_vm0, %v340_v38  ;;  %v268_v38 = vld [vmem:[%s3109_s6 + $0xe0] sm:$0xff] }
  0x7d   : > { %2484 = vmatmul.msk.f32.gmra.mxu3 %vm496_vm0, %v356_v39  ;;  %v332_v39 = vmul.f32 0.17677669, %v268_v38  ;;  %v444_v38 = vld [vmem:[%s3318_s9 + $0x60] sm:$0xff] }
  0x82   : > { %2389 = vmatmul.msk.f32.gmra.mxu0 %vm496_vm0, %v309_v44  ;;  %v317_v44 = vmul.f32 0.17677669, %v253_v42  ;;  %v494_v42 = vld [vmem:[%s3318_s9 + $0x1f0] sm:$0xff] }
  0x83   : > { %2421 = vmatmul.msk.f32.gmra.mxu1 %vm496_vm0, %v325_v45  ;;  %v333_v45 = vmul.f32 0.17677669, %v269_v43  ;;  %v442_v43 = vld [vmem:[%s3318_s9 + $0x50] sm:$0xff] }
  0x84   : > { %2453 = vmatmul.msk.f32.gmra.mxu2 %vm496_vm0, %v341_v46  ;;  %v301_v46 = vld [vmem:[%s3109_s6 + $0x1e8] sm:$0xff] }
  0x85   : > { %2485 = vmatmul.msk.f32.gmra.mxu3 %vm496_vm0, %v357_v47  ;;  %v365_v47 = vmul.f32 0.17677669, %v301_v46  ;;  %v457_v46 = vld [vmem:[%s3318_s9 + $0xc8] sm:$0xff] }
  0x8a   : > { %2390 = vmatmul.msk.f32.gmra.mxu0 %vm496_vm0, %v310_v52  ;;  %v302_v52 = vld [vmem:[%s3109_s6 + $0x1f0] sm:$0xff] }
  0x8b   : > { %2422 = vmatmul.msk.f32.gmra.mxu1 %vm496_vm0, %v326_v53  ;;  %v334_v53 = vmul.f32 0.17677669, %v270_v50  ;;  %v475_v50 = vld [vmem:[%s3318_s9 + $0x158] sm:$0xff] }
  0x8c   : > { %2454 = vmatmul.msk.f32.gmra.mxu2 %vm496_vm0, %v342_v54  ;;  %v350_v54 = vmul.f32 0.17677669, %v286_v51  ;;  %v492_v51 = vld [vmem:[%s3318_s9 + $0x1e0] sm:$0xff] }
  0x8d   : > { %2486 = vmatmul.msk.f32.gmra.mxu3 %vm496_vm0, %v358_v55  ;;  %v366_v55 = vmul.f32 0.17677669, %v302_v52 }
  0x92   : > { %2391 = vmatmul.msk.f32.gmra.mxu0 %vm496_vm0, %v311_v60  ;;  %v303_v60 = vld [vmem:[%s3109_s6 + $0x1f8] sm:$0xff]  ;;  %s2837_s6 = scalar_lea.hbm %s2836_s5, 128 }
  0x93   : > { %2423 = vmatmul.msk.f32.gmra.mxu1 %vm496_vm0, %v327_v61  ;;  %v319_v61 = vmul.f32 0.17677669, %v255_v58  ;;  %v439_v58 = vld [vmem:[%s3318_s9 + $0x38] sm:$0xff]  ;;  %p2838_p12 = scmp.ne.s32.totalorder %s2836_s5, %s2837_s6 }
  0x94   : > { %2455 = vmatmul.msk.f32.gmra.mxu2 %vm496_vm0, %v343_v62  ;;  %v351_v62 = vmul.f32 0.17677669, %v287_v59  ;;  %v474_v59 = vld [vmem:[%s3318_s9 + $0x150] sm:$0xff] }
  0x95   : > { %2487 = vmatmul.msk.f32.gmra.mxu3 %vm496_vm0, %v359_v63  ;;  %v367_v63 = vmul.f32 0.17677669, %v303_v60  ;;  %v455_v60 = vld [vmem:[%s3318_s9 + $0xb8] sm:$0xff]  ;;  %p2839_p13 = pnand %p2838_p12, %p2966_p4 }
  0x97   : > { %p2840_p0 = pneg %p2839_p13 }
  0x9a   : > { %2392 = vmatmul.msk.f32.gmra.mxu0 %vm496_vm0, %v312_v4  ;;  %v335_v4 = vmul.f32 0.17677669, %v271_v2  ;;  %v490_v2 = vld [vmem:[%s3318_s9 + $0x1d0] sm:$0xff] }
  0x9b   : > { %2424 = vmatmul.msk.f32.gmra.mxu1 %vm496_vm0, %v328_v5 }
  0x9c   : > { %2456 = vmatmul.msk.f32.gmra.mxu2 %vm496_vm0, %v344_v6 }
  0x9d   : > { %2488 = vmatmul.msk.f32.gmra.mxu3 %vm496_vm0, %v360_v7 }
  0xa2   : > { %2393 = vmatmul.msk.f32.gmra.mxu0 %vm496_vm0, %v313_v12 }
  0xa3   : > { %2425 = vmatmul.msk.f32.gmra.mxu1 %vm496_vm0, %v329_v13 }
  0xa4   : > { %2457 = vmatmul.msk.f32.gmra.mxu2 %vm496_vm0, %v345_v14 }
  0xa5   : > { %2489 = vmatmul.msk.f32.gmra.mxu3 %vm496_vm0, %v361_v15 }
  0xaa   : > { %2394 = vmatmul.msk.f32.gmra.mxu0 %vm496_vm0, %v314_v20 }
  0xab   : > { %2426 = vmatmul.msk.f32.gmra.mxu1 %vm496_vm0, %v330_v21 }
  0xac   : > { %2458 = vmatmul.msk.f32.gmra.mxu2 %vm496_vm0, %v346_v22  ;;  %v463_v22 = vld [vmem:[%s3318_s9 + $0xf8] sm:$0xff] }
  0xad   : > { %2490 = vmatmul.msk.f32.gmra.mxu3 %vm496_vm0, %v362_v23  ;;  %1654 = vmatpush.msrb.mxu1 %v463_v22  ;;  %v479_v23 = vld [vmem:[%s3318_s9 + $0x178] sm:$0xff]  ;;  %v454_v22 = vld [vmem:[%s3318_s9 + $0xb0] sm:$0xff] }
  0xae   : > { %1719 = vmatpush.msrb.mxu2 %v479_v23 }
  0xaf   : > { %1655 = vmatpush.msrb.mxu1 %v462_v27  ;;  %v437_v27 = vld [vmem:[%s3318_s9 + $0x28] sm:$0xff] }
  0xb1   : > { %1656 = vmatpush.msrb.mxu1 %v461_v32  ;;  %v436_v32 = vld [vmem:[%s3318_s9 + $0x20] sm:$0xff] }
  0xb2   : > { %2395 = vmatmul.msk.f32.gmra.mxu0 %vm496_vm0, %v315_v28  ;;  %v447_v28 = vld [vmem:[%s3318_s9 + $0x78] sm:$0xff] }
  0xb3   : > { %2427 = vmatmul.msk.f32.gmra.mxu1 %vm496_vm0, %v331_v29  ;;  %v478_v29 = vld [vmem:[%s3318_s9 + $0x170] sm:$0xff]  ;;  %1589 = vmatpush.msrb.mxu0 %v447_v28  ;;  %v472_v28 = vld [vmem:[%s3318_s9 + $0x140] sm:$0xff] }
  0xb4   : > { %2459 = vmatmul.msk.f32.gmra.mxu2 %vm496_vm0, %v347_v30  ;;  %v495_v30 = vld [vmem:[%s3318_s9 + $0x1f8] sm:$0xff] }
  0xb5   : > { %2491 = vmatmul.msk.f32.gmra.mxu3 %vm496_vm0, %v363_v31  ;;  %v446_v31 = vld [vmem:[%s3318_s9 + $0x70] sm:$0xff]  ;;  %1720 = vmatpush.msrb.mxu2 %v478_v29 }
  0xb6   : > { %1784 = vmatpush.msrb.mxu3 %v495_v30  ;;  %1590 = vmatpush.msrb.mxu0 %v446_v31  ;;  %v453_v30 = vld [vmem:[%s3318_s9 + $0xa8] sm:$0xff] }
  0xb7   : > { %v489_v31 = vld [vmem:[%s3318_s9 + $0x1c8] sm:$0xff] }
  0xb8   : > { %1591 = vmatpush.msrb.mxu0 %v445_v34  ;;  %1785 = vmatpush.msrb.mxu3 %v494_v42  ;;  %v471_v34 = vld [vmem:[%s3318_s9 + $0x138] sm:$0xff] }
  0xb9   : > { %v487_v42 = vld [vmem:[%s3318_s9 + $0x1b8] sm:$0xff] }
  0xba   : > { %2396 = vmatmul.msk.f32.gmra.mxu0 %vm496_vm0, %v316_v35  ;;  %v460_v35 = vld [vmem:[%s3318_s9 + $0xe0] sm:$0xff]  ;;  %1786 = vmatpush.msrb.mxu3 %v493_v48  ;;  %v486_v48 = vld [vmem:[%s3318_s9 + $0x1b0] sm:$0xff] }
  0xbb   : > { %2428 = vmatmul.msk.f32.gmra.mxu1 %vm496_vm0, %v332_v39  ;;  %v443_v39 = vld [vmem:[%s3318_s9 + $0x58] sm:$0xff]  ;;  %1592 = vmatpush.msrb.mxu0 %v444_v38  ;;  %v488_v38 = vld [vmem:[%s3318_s9 + $0x1c0] sm:$0xff] }
  0xbc   : > { %2460 = vmatmul.msk.f32.gmra.mxu2 %vm496_vm0, %v348_v36  ;;  %1657 = vmatpush.msrb.mxu1 %v460_v35  ;;  %v452_v35 = vld [vmem:[%s3318_s9 + $0xa0] sm:$0xff] }
  0xbd   : > { %2492 = vmatmul.msk.f32.gmra.mxu3 %vm496_vm0, %v364_v37  ;;  %1593 = vmatpush.msrb.mxu0 %v443_v39  ;;  %v435_v39 = vld [vmem:[%s3318_s9 + $0x18] sm:$0xff] }
  0xbe   : > { %1658 = vmatpush.msrb.mxu1 %v459_v40  ;;  %1787 = vmatpush.msrb.mxu3 %v492_v51  ;;  %v470_v40 = vld [vmem:[%s3318_s9 + $0x130] sm:$0xff]  ;;  %v433_v51 = vld [vmem:[%s3318_s9 + $0x8] sm:$0xff] }
  0xbf   : > { %1594 = vmatpush.msrb.mxu0 %v442_v43 }
  0xc2   : > { %2397 = vmatmul.msk.f32.gmra.mxu0 %vm496_vm0, %v317_v44  ;;  %v458_v44 = vld [vmem:[%s3318_s9 + $0xd0] sm:$0xff] }
  0xc3   : > { %2429 = vmatmul.msk.f32.gmra.mxu1 %vm496_vm0, %v333_v45 }
  0xc4   : > { %2461 = vmatmul.msk.f32.gmra.mxu2 %vm496_vm0, %v349_v41  ;;  %v477_v41 = vld [vmem:[%s3318_s9 + $0x168] sm:$0xff]  ;;  %1659 = vmatpush.msrb.mxu1 %v458_v44  ;;  %v434_v44 = vld [vmem:[%s3318_s9 + $0x10] sm:$0xff] }
  0xc5   : > { %2493 = vmatmul.msk.f32.gmra.mxu3 %vm496_vm0, %v365_v47  ;;  %1721 = vmatpush.msrb.mxu2 %v477_v41  ;;  %v476_v47 = vld [vmem:[%s3318_s9 + $0x160] sm:$0xff]  ;;  %v451_v41 = vld [vmem:[%s3318_s9 + $0x98] sm:$0xff] }
  0xc6   : > { %1660 = vmatpush.msrb.mxu1 %v457_v46  ;;  %v469_v46 = vld [vmem:[%s3318_s9 + $0x128] sm:$0xff] }
  0xc7   : > { %1722 = vmatpush.msrb.mxu2 %v476_v47  ;;  %v450_v47 = vld [vmem:[%s3318_s9 + $0x90] sm:$0xff] }
  0xc9   : > { %1723 = vmatpush.msrb.mxu2 %v475_v50 }
  0xca   : > { %2398 = vmatmul.msk.f32.gmra.mxu0 %vm496_vm0, %v318_v49  ;;  %v441_v49 = vld [vmem:[%s3318_s9 + $0x48] sm:$0xff] }
  0xcb   : > { %2430 = vmatmul.msk.f32.gmra.mxu1 %vm496_vm0, %v334_v53  ;;  %1595 = vmatpush.msrb.mxu0 %v441_v49 }
  0xcc   : > { %2462 = vmatmul.msk.f32.gmra.mxu2 %vm496_vm0, %v350_v54  ;;  %v440_v54 = vld [vmem:[%s3318_s9 + $0x40] sm:$0xff] }
  0xcd   : > { %2494 = vmatmul.msk.f32.gmra.mxu3 %vm496_vm0, %v366_v55  ;;  %v456_v55 = vld [vmem:[%s3318_s9 + $0xc0] sm:$0xff]  ;;  %1596 = vmatpush.msrb.mxu0 %v440_v54  ;;  %v449_v54 = vld [vmem:[%s3318_s9 + $0x88] sm:$0xff] }
  0xce   : > { %1661 = vmatpush.msrb.mxu1 %v456_v55  ;;  %1724 = vmatpush.msrb.mxu2 %v474_v59  ;;  %v468_v55 = vld [vmem:[%s3318_s9 + $0x120] sm:$0xff] }
  0xcf   : > { %1597 = vmatpush.msrb.mxu0 %v439_v58  ;;  %v485_v58 = vld [vmem:[%s3318_s9 + $0x1a8] sm:$0xff]  ;;  %v432_v59 = vld [vmem:[%s3318_s9] sm:$0xff] }
  0xd0   : > { %1662 = vmatpush.msrb.mxu1 %v455_v60  ;;  %v448_v60 = vld [vmem:[%s3318_s9 + $0x80] sm:$0xff] }
  0xd2   : > { %2399 = vmatmul.msk.f32.gmra.mxu0 %vm496_vm0, %v319_v61  ;;  %v491_v61 = vld [vmem:[%s3318_s9 + $0x1d8] sm:$0xff]  ;;  %1663 = vmatpush.msrb.mxu1 %v454_v22 }
  0xd3   : > { %2431 = vmatmul.msk.f32.gmra.mxu1 %vm496_vm0, %v335_v4  ;;  %1788 = vmatpush.msrb.mxu3 %v491_v61  ;;  %v467_v61 = vld [vmem:[%s3318_s9 + $0x118] sm:$0xff] }
  0xd4   : > { %2463 = vmatmul.msk.f32.gmra.mxu2 %vm496_vm0, %v351_v62  ;;  %v438_v62 = vld [vmem:[%s3318_s9 + $0x30] sm:$0xff]  ;;  %1664 = vmatpush.msrb.mxu1 %v453_v30  ;;  %v483_v22 = vld [vmem:[%s3318_s9 + $0x198] sm:$0xff]  ;;  %v465_v30 = vld [vmem:[%s3318_s9 + $0x108] sm:$0xff] }
  0xd5   : > { %2495 = vmatmul.msk.f32.gmra.mxu3 %vm496_vm0, %v367_v63  ;;  %v473_v63 = vld [vmem:[%s3318_s9 + $0x148] sm:$0xff]  ;;  %1598 = vmatpush.msrb.mxu0 %v438_v62  ;;  %v484_v62 = vld [vmem:[%s3318_s9 + $0x1a0] sm:$0xff] }
  0xd6   : > { %1725 = vmatpush.msrb.mxu2 %v473_v63  ;;  %1789 = vmatpush.msrb.mxu3 %v490_v2  ;;  %v466_v2 = vld [vmem:[%s3318_s9 + $0x110] sm:$0xff] }
  0xd7   : > { %v3245_v56 = vpop.f32.mrf.mxu0  ;;  %1599 = vmatpush.msrb.mxu0 %v437_v27  ;;  %1665 = vmatpush.msrb.mxu1 %v452_v35 }
  0xd8   : > { %v3247_v57 = vpop.f32.mrf.mxu1  ;;  %1141 = vmax.xlane.f32.xlu0 %v3245_v56  ;;  %1726 = vmatpush.msrb.mxu2 %v472_v28 }
  0xd9   : > { %1173 = vmax.xlane.f32.xlu1 %v3247_v57  ;;  %1790 = vmatpush.msrb.mxu3 %v489_v31  ;;  %v482_v31 = vld [vmem:[%s3318_s9 + $0x190] sm:$0xff] }
  0xda   : > { %1600 = vmatpush.msrb.mxu0 %v436_v32  ;;  %1727 = vmatpush.msrb.mxu2 %v471_v34  ;;  %v464_v32 = vld [vmem:[%s3318_s9 + $0x100] sm:$0xff]  ;;  %v481_v34 = vld [vmem:[%s3318_s9 + $0x188] sm:$0xff] }
  0xdb   : > { %1791 = vmatpush.msrb.mxu3 %v488_v38  ;;  %1666 = vmatpush.msrb.mxu1 %v451_v41  ;;  %v480_v38 = vld [vmem:[%s3318_s9 + $0x180] sm:$0xff]  ;;  %s2841_s9 = scalar_lea.hbm %s4115_s3, 256 }
  0xdc   : > { %1601 = vmatpush.msrb.mxu0 %v435_v39  ;;  %1728 = vmatpush.msrb.mxu2 %v470_v40  ;;  %p2843_p2 = scmp.lt.s32.totalorder %s2841_s9, %s2837_s6 }
  0xdd   : > { %1792 = vmatpush.msrb.mxu3 %v487_v42  ;;  %1667 = vmatpush.msrb.mxu1 %v450_v47 }
  0xde   : > { %1602 = vmatpush.msrb.mxu0 %v434_v44  ;;  %1729 = vmatpush.msrb.mxu2 %v469_v46  ;;  %p2844_p3 = por %p2843_p2, %p2842_p1 }
  0xdf   : > { %v3257_v0 = vpop.f32.mrf.mxu2  ;;  %v3263_v3 = vpop.f32.mrf.mxu0  ;;  %1793 = vmatpush.msrb.mxu3 %v486_v48  ;;  %1668 = vmatpush.msrb.mxu1 %v449_v54 }
  0xe0   : > { %v3259_v1 = vpop.f32.mrf.mxu3  ;;  %1205 = vmax.xlane.f32.xlu2 %v3257_v0  ;;  %v3267_v5 = vpop.f32.mrf.mxu1  ;;  %1603 = vmatpush.msrb.mxu0 %v433_v51  ;;  %p2845_p5 = pnand %p2844_p3, %p2840_p0 }
  0xe1   : > { %1237 = vmax.xlane.f32.xlu0 %v3259_v1  ;;  %1730 = vmatpush.msrb.mxu2 %v468_v55 }
  0xe2   : > { %1794 = vmatpush.msrb.mxu3 %v485_v58  ;;  %1604 = vmatpush.msrb.mxu0 %v432_v59 }
  0xe3   : > { %1669 = vmatpush.msrb.mxu1 %v448_v60  ;;  %1731 = vmatpush.msrb.mxu2 %v467_v61 }
  0xe4   : > { %1795 = vmatpush.msrb.mxu3 %v484_v62 }
  0xe5   : > { %1732 = vmatpush.msrb.mxu2 %v466_v2 }
  0xe6   : > { %1796 = vmatpush.msrb.mxu3 %v483_v22 }
  0xe7   : > { %v3269_v6 = vpop.f32.mrf.mxu2  ;;  %v3276_v8 = vpop.f32.mrf.mxu0  ;;  %1733 = vmatpush.msrb.mxu2 %v465_v30 }
  0xe8   : > { %v3271_v7 = vpop.f32.mrf.mxu3  ;;  %1175 = vmax.xlane.f32.xlu2 %v3267_v5  ;;  %v3285_v11 = vpop.f32.mrf.mxu1  ;;  %1797 = vmatpush.msrb.mxu3 %v482_v31 }
  0xe9   : > { %1239 = vmax.xlane.f32.xlu1 %v3271_v7  ;;  %1143 = vmax.xlane.f32.xlu0 %v3263_v3 }
  0xea   : > { %1734 = vmatpush.msrb.mxu2 %v464_v32  ;;  %1798 = vmatpush.msrb.mxu3 %v481_v34 }
  0xec   : > { %1799 = vmatpush.msrb.mxu3 %v480_v38 }
  0xef   : > { %v3278_v9 = vpop.f32.mrf.mxu2  ;;  %v3287_v12 = vpop.f32.mrf.mxu0 }
  0xf0   : > { %v3280_v10 = vpop.f32.mrf.mxu3  ;;  %v3294_v14 = vpop.f32.mrf.mxu1 }
  0xf1   : > { %1241 = vmax.xlane.f32.xlu2 %v3280_v10  ;;  %1145 = vmax.xlane.f32.xlu1 %v3276_v8 }
  0xf2   : > { %1207 = vmax.xlane.f32.xlu0 %v3269_v6 }
  0xf7   : > { %v3289_v13 = vpop.f32.mrf.mxu2  ;;  %v3296_v15 = vpop.f32.mrf.mxu0 }
  0xf8   : > { %v3298_v16 = vpop.f32.mrf.mxu3  ;;  %v3303_v17 = vpop.f32.mrf.mxu1 }
  0xf9   : > { %1211 = vmax.xlane.f32.xlu2 %v3289_v13  ;;  %1209 = vmax.xlane.f32.xlu1 %v3278_v9 }
  0xfa   : > { %1177 = vmax.xlane.f32.xlu0 %v3285_v11 }
  0xff   : > { %v3305_v18 = vpop.f32.mrf.mxu2  ;;  %v3312_v20 = vpop.f32.mrf.mxu0 }
 0x100   : > { %v3310_v19 = vpop.f32.mrf.mxu3  ;;  %v3320_v21 = vpop.f32.mrf.mxu1 }
 0x101   : > { %1147 = vmax.xlane.f32.xlu1 %v3287_v12  ;;  %1149 = vmax.xlane.f32.xlu2 %v3296_v15 }
 0x102   : > { %1243 = vmax.xlane.f32.xlu0 %v3298_v16 }
 0x107   : > { %v3327_v24 = vpop.f32.mrf.mxu2  ;;  %v3331_v26 = vpop.f32.mrf.mxu0 }
 0x108   : > { %v3329_v25 = vpop.f32.mrf.mxu3  ;;  %v3342_v33 = vpop.f32.mrf.mxu1 }
 0x109   : > { %1179 = vmax.xlane.f32.xlu1 %v3294_v14  ;;  %1181 = vmax.xlane.f32.xlu2 %v3303_v17 }
 0x10a   : > { %1213 = vmax.xlane.f32.xlu0 %v3305_v18 }
 0x10f   : > { %v3346_v36 = vpop.f32.mrf.mxu2  ;;  %v3360_v45 = vpop.f32.mrf.mxu0 }
 0x110   : > { %v3348_v37 = vpop.f32.mrf.mxu3  ;;  %v3368_v52 = vpop.f32.mrf.mxu1 }
 0x111   : > { %1245 = vmax.xlane.f32.xlu1 %v3310_v19  ;;  %1151 = vmax.xlane.f32.xlu2 %v3312_v20 }
 0x112   : > { %1183 = vmax.xlane.f32.xlu0 %v3320_v21 }
 0x117   : > { %v3370_v53 = vpop.f32.mrf.mxu2  ;;  %v3387_v23 = vpop.f32.mrf.mxu0 }
 0x118   : > { %v3384_v4 = vpop.f32.mrf.mxu3  ;;  %v3391_v29 = vpop.f32.mrf.mxu1 }
 0x119   : > { %1215 = vmax.xlane.f32.xlu1 %v3327_v24  ;;  %1247 = vmax.xlane.f32.xlu2 %v3329_v25 }
 0x11a   : > { %1153 = vmax.xlane.f32.xlu0 %v3331_v26 }
 0x11f   : > { %v3406_v43 = vpop.f32.mrf.mxu2  ;;  %v3414_v50 = vpop.f32.mrf.mxu0 }
 0x120   : > { %v3412_v49 = vpop.f32.mrf.mxu3  ;;  %v3427_v63 = vpop.f32.mrf.mxu1 }
 0x121   : > { %1185 = vmax.xlane.f32.xlu1 %v3342_v33  ;;  %1217 = vmax.xlane.f32.xlu2 %v3346_v36 }
 0x122   : > { %1249 = vmax.xlane.f32.xlu0 %v3348_v37 }
 0x127   : > { %v3431_v27 = vpop.f32.mrf.mxu2  ;;  %v3442_v35 = vpop.f32.mrf.mxu0 }
 0x128   : > { %v3433_v28 = vpop.f32.mrf.mxu3  ;;  %v3445_v39 = vpop.f32.mrf.mxu1 }
 0x129   : > { %1187 = vmax.xlane.f32.xlu2 %v3368_v52  ;;  %1155 = vmax.xlane.f32.xlu1 %v3360_v45 }
 0x12a   : > { %1219 = vmax.xlane.f32.xlu0 %v3370_v53 }
 0x12f   : > { %v3447_v40 = vpop.f32.mrf.mxu2  ;;  %v3456_v48 = vpop.f32.mrf.mxu0 }
 0x130   : > { %v3452_v41 = vpop.f32.mrf.mxu3  ;;  %v3458_v51 = vpop.f32.mrf.mxu1 }
 0x131   : > { %1251 = vmax.xlane.f32.xlu1 %v3384_v4  ;;  %1157 = vmax.xlane.f32.xlu2 %v3387_v23 }
 0x132   : > { %1189 = vmax.xlane.f32.xlu0 %v3391_v29 }
 0x137   : > { %v3463_v59 = vpop.f32.mrf.mxu2  ;;  %v3471_v30 = vpop.f32.mrf.mxu0 }
 0x138   : > { %v3467_v61 = vpop.f32.mrf.mxu3 }
 0x139   : > { %1221 = vmax.xlane.f32.xlu1 %v3406_v43  ;;  %1253 = vmax.xlane.f32.xlu2 %v3412_v49 }
 0x13a   : > { %1159 = vmax.xlane.f32.xlu0 %v3414_v50 }
 0x141   : > { %1191 = vmax.xlane.f32.xlu1 %v3427_v63  ;;  %1223 = vmax.xlane.f32.xlu2 %v3431_v27 }
 0x142   : > { %1255 = vmax.xlane.f32.xlu0 %v3433_v28 }
 0x149   : > { %1193 = vmax.xlane.f32.xlu2 %v3445_v39  ;;  %1161 = vmax.xlane.f32.xlu1 %v3442_v35 }
 0x14a   : > { %1225 = vmax.xlane.f32.xlu0 %v3447_v40 }
 0x14b   : > { %v1142_v44 = vpop.xlane.xlu0 %1141 }
 0x14c   : > { %v1174_v42 = vpop.xlane.xlu1 %1173  ;;  %v1269_v47 = vsub.f32 %v3245_v56, %v1142_v44 }
 0x14d   : > { %v1285_v46 = vsub.f32 %v3247_v57, %v1174_v42 }
 0x14e   : > { %v1333_v55 = vmul.f32 1.442695, %v1269_v47 }
 0x14f   : > { %v1365_v54 = vmul.f32 1.442695, %v1285_v46  ;;  %v3485_v46 = vpop.f32.mrf.mxu2 }
 0x150   : > { %4126 = vst [vmem:[#allocation5_spill] sm:$0xff] %v3485_v46 }
 0x151   : > { %1257 = vmax.xlane.f32.xlu1 %v3452_v41  ;;  %1163 = vmax.xlane.f32.xlu2 %v3456_v48  ;;  %2565 = vpow2.f32 %v1365_v54 }
 0x152   : > { %1195 = vmax.xlane.f32.xlu0 %v3458_v51  ;;  %2567 = vpow2.f32 %v1333_v55 }
 0x153   : > { %v1206_v58 = vpop.xlane.xlu2 %1205 }
 0x154   : > { %v1301_v57 = vsub.f32 %v3257_v0, %v1206_v58  ;;  %v1238_v56 = vpop.xlane.xlu0 %1237  ;;  %v3480_v0 = vpop.f32.mrf.mxu1 }
 0x155   : > { %v1317_v60 = vsub.f32 %v3259_v1, %v1238_v56  ;;  %v3492_v56 = vpop.f32.mrf.mxu3 }
 0x156   : > { %v1397_v62 = vmul.f32 1.442695, %v1301_v57  ;;  %4127 = vst [vmem:[#allocation6_spill] sm:$0xff] %v3492_v56 }
 0x157   : > { %v3469_v2 = vpop.eup %2565  ;;  %v1429_v22 = vmul.f32 1.442695, %v1317_v60 }
 0x158   : > { %v3473_v31 = vpop.eup %2567  ;;  %2569 = vpow2.f32 %v1397_v62  ;;  %1670 = vmatmul.f32.vlgmr.msrb.gmra.mxu1 %v3469_v2 }
 0x159   : > { %1227 = vmax.xlane.f32.xlu1 %v3463_v59  ;;  %1259 = vmax.xlane.f32.xlu2 %v3467_v61  ;;  %2571 = vpow2.f32 %v1429_v22 }
 0x15a   : > { %1605 = vmatmul.f32.vlgmr.msrb.gmra.mxu0 %v3473_v31  ;;  %1165 = vmax.xlane.f32.xlu0 %v3471_v30 }
 0x15b   : > { %v1176_v32 = vpop.xlane.xlu2 %1175 }
 0x15c   : > { %v1240_v1 = vpop.xlane.xlu1 %1239  ;;  %v1286_v38 = vsub.f32 %v3267_v5, %v1176_v32  ;;  %v1144_v42 = vpop.xlane.xlu0 %1143 }
 0x15d   : > { %v1318_v34 = vsub.f32 %v3271_v7, %v1240_v1  ;;  %v1270_v44 = vsub.f32 %v3263_v3, %v1144_v42  ;;  %v3498_v3 = vpop.f32.mrf.mxu0  ;;  %v3503_v32 = vpop.f32.mrf.mxu1 }
 0x15e   : > { %v3487_v47 = vpop.eup %2569  ;;  %v1367_v54 = vmul.f32 1.442695, %v1286_v38  ;;  %4128 = vst [vmem:[#allocation7_spill] sm:$0xff] %v3498_v3 }
 0x15f   : > { %v3489_v55 = vpop.eup %2571  ;;  %v1431_v58 = vmul.f32 1.442695, %v1318_v34  ;;  %v1335_v57 = vmul.f32 1.442695, %v1270_v44  ;;  %1735 = vmatmul.f32.vlgmr.msrb.gmra.mxu2 %v3487_v47  ;;  %4129 = vst [vmem:[#allocation8_spill] sm:$0xff] %v3503_v32 }
 0x160   : > { %2573 = vpow2.f32 %v1367_v54  ;;  %1800 = vmatmul.f32.vlgmr.msrb.gmra.mxu3 %v3489_v55  ;;  %v3507_v54 = vpop.f32.mrf.mxu2 }
 0x161   : > { %1197 = vmax.xlane.f32.xlu1 %v3480_v0  ;;  %1229 = vmax.xlane.f32.xlu2 %v3485_v46  ;;  %2575 = vpow2.f32 %v1335_v57  ;;  %4130 = vst [vmem:[#allocation9_spill] sm:$0xff] %v3507_v54 }
 0x162   : > { %1261 = vmax.xlane.f32.xlu0 %v3492_v56  ;;  %2577 = vpow2.f32 %v1431_v58 }
 0x164   : > { %v1242_v5 = vpop.xlane.xlu2 %1241  ;;  %v1146_v7 = vpop.xlane.xlu1 %1145 }
 0x165   : > { %v1319_v60 = vsub.f32 %v3280_v10, %v1242_v5  ;;  %v1271_v62 = vsub.f32 %v3276_v8, %v1146_v7  ;;  %v1208_v22 = vpop.xlane.xlu0 %1207 }
 0x166   : > { %v1302_v1 = vsub.f32 %v3269_v6, %v1208_v22  ;;  %v3505_v38 = vpop.eup %2573  ;;  %v3519_v6 = vpop.f32.mrf.mxu3 }
 0x167   : > { %v1337_v34 = vmul.f32 1.442695, %v1271_v62  ;;  %v1433_v42 = vmul.f32 1.442695, %v1319_v60  ;;  %v3509_v57 = vpop.eup %2575  ;;  %1673 = vmatmul.f32.gmra.mxu1 %v3505_v38  ;;  %4131 = vst [vmem:[#allocation10_spill] sm:$0xff] %v3519_v6  ;;  %v3523_v62 = vpop.f32.mrf.mxu0 }
 0x168   : > { %v1399_v44 = vmul.f32 1.442695, %v1302_v1  ;;  %v3513_v10 = vpop.eup %2577  ;;  %1608 = vmatmul.f32.gmra.mxu0 %v3509_v57  ;;  %4132 = vst [vmem:[#allocation11_spill] sm:$0xff] %v3523_v62 }
 0x169   : > { %1199 = vmax.xlane.f32.xlu2 %v3503_v32  ;;  %2579 = vpow2.f32 %v1337_v34  ;;  %1167 = vmax.xlane.f32.xlu1 %v3498_v3 }
 0x16a   : > { %2581 = vpow2.f32 %v1399_v44  ;;  %1803 = vmatmul.f32.gmra.mxu3 %v3513_v10  ;;  %1231 = vmax.xlane.f32.xlu0 %v3507_v54  ;;  %v3530_v54 = vpop.f32.mrf.mxu1 }
 0x16b   : > { %2583 = vpow2.f32 %v1433_v42 }
 0x16c   : > { %v1212_v8 = vpop.xlane.xlu2 %1211  ;;  %v1210_v58 = vpop.xlane.xlu1 %1209 }
 0x16d   : > { %v1303_v5 = vsub.f32 %v3278_v9, %v1210_v58  ;;  %v1178_v7 = vpop.xlane.xlu0 %1177  ;;  %v3538_v9 = vpop.f32.mrf.mxu2 }
 0x16e   : > { %v1287_v60 = vsub.f32 %v3285_v11, %v1178_v7  ;;  %v1304_v11 = vsub.f32 %v3289_v13, %v1212_v8 }
 0x16f   : > { %v3525_v22 = vpop.eup %2579  ;;  %v1401_v1 = vmul.f32 1.442695, %v1303_v5  ;;  %v3550_v13 = vpop.f32.mrf.mxu0 }
 0x170   : > { %v1369_v34 = vmul.f32 1.442695, %v1287_v60  ;;  %v3527_v44 = vpop.eup %2581  ;;  %1611 = vmatmul.f32.gmra.mxu0 %v3525_v22  ;;  %v1403_v3 = vmul.f32 1.442695, %v1304_v11 }
 0x171   : > { %1169 = vmax.xlane.f32.xlu2 %v3523_v62  ;;  %v3532_v42 = vpop.eup %2583  ;;  %1263 = vmax.xlane.f32.xlu1 %v3519_v6  ;;  %v3544_v62 = vpop.f32.mrf.mxu3 }
 0x172   : > { %2585 = vpow2.f32 %v1369_v34  ;;  %1738 = vmatmul.f32.gmra.mxu2 %v3527_v44  ;;  %1806 = vmatmul.f32.gmra.mxu3 %v3532_v42 }
 0x173   : > { %2587 = vpow2.f32 %v1401_v1  ;;  %1201 = vmax.xlane.f32.xlu0 %v3530_v54 }
 0x174   : > { %v1148_v58 = vpop.xlane.xlu1 %1147  ;;  %v1150_v5 = vpop.xlane.xlu2 %1149 }
 0x175   : > { %v1272_v7 = vsub.f32 %v3287_v12, %v1148_v58  ;;  %v1244_v60 = vpop.xlane.xlu0 %1243  ;;  %v1273_v32 = vsub.f32 %v3296_v15, %v1150_v5  ;;  %v3560_v58 = vpop.f32.mrf.mxu2 }
 0x176   : > { %v1320_v6 = vsub.f32 %v3298_v16, %v1244_v60  ;;  %v3564_v60 = vpop.f32.mrf.mxu1 }
 0x177   : > { %v1339_v34 = vmul.f32 1.442695, %v1272_v7  ;;  %v1341_v12 = vmul.f32 1.442695, %v1273_v32  ;;  %4133 = vst [vmem:[#allocation12_spill] sm:$0xff] %v3564_v60 }
 0x178   : > { %v1435_v56 = vmul.f32 1.442695, %v1320_v6  ;;  %v3547_v46 = vpop.eup %2585 }
 0x179   : > { %2589 = vpow2.f32 %v1339_v34  ;;  %1265 = vmax.xlane.f32.xlu2 %v3544_v62  ;;  %v3552_v8 = vpop.eup %2587  ;;  %1233 = vmax.xlane.f32.xlu1 %v3538_v9 }
 0x17a   : > { %1676 = vmatmul.f32.gmra.mxu1 %v3547_v46  ;;  %2591 = vpow2.f32 %v1435_v56  ;;  %1741 = vmatmul.f32.gmra.mxu2 %v3552_v8 }
 0x17b   : > { %2593 = vpow2.f32 %v1403_v3  ;;  %1171 = vmax.xlane.f32.xlu0 %v3550_v13 }
 0x17c   : > { %v1180_v15 = vpop.xlane.xlu1 %1179  ;;  %v1182_v16 = vpop.xlane.xlu2 %1181  ;;  %2595 = vpow2.f32 %v1341_v12 }
 0x17d   : > { %v1288_v6 = vsub.f32 %v3294_v14, %v1180_v15  ;;  %v1214_v1 = vpop.xlane.xlu0 %1213  ;;  %v1289_v56 = vsub.f32 %v3303_v17, %v1182_v16  ;;  %v3571_v14 = vpop.f32.mrf.mxu3 }
 0x17e   : > { %v1305_v11 = vsub.f32 %v3305_v18, %v1214_v1 }
 0x17f   : > { %v3562_v5 = vpop.eup %2589  ;;  %v1371_v7 = vmul.f32 1.442695, %v1288_v6  ;;  %v1373_v17 = vmul.f32 1.442695, %v1289_v56 }
 0x180   : > { %v1405_v3 = vmul.f32 1.442695, %v1305_v11  ;;  %1614 = vmatmul.f32.gmra.mxu0 %v3562_v5  ;;  %v3568_v32 = vpop.eup %2591 }
 0x181   : > { %2597 = vpow2.f32 %v1371_v7  ;;  %1235 = vmax.xlane.f32.xlu2 %v3560_v58  ;;  %v3573_v18 = vpop.eup %2593  ;;  %1203 = vmax.xlane.f32.xlu1 %v3564_v60 }
 0x182   : > { %1809 = vmatmul.f32.gmra.mxu3 %v3568_v32  ;;  %2599 = vpow2.f32 %v1405_v3  ;;  %1744 = vmatmul.f32.gmra.mxu2 %v3573_v18  ;;  %v3581_v1 = vpop.eup %2595 }
 0x183   : > { %1267 = vmax.xlane.f32.xlu0 %v3571_v14  ;;  %2601 = vpow2.f32 %v1373_v17 }
 0x184   : > { %v1246_v34 = vpop.xlane.xlu1 %1245  ;;  %v1152_v12 = vpop.xlane.xlu2 %1151 }
 0x185   : > { %v1321_v15 = vsub.f32 %v3310_v19, %v1246_v34  ;;  %v1274_v16 = vsub.f32 %v3312_v20, %v1152_v12  ;;  %v1184_v6 = vpop.xlane.xlu0 %1183 }
 0x186   : > { %v1290_v3 = vsub.f32 %v3320_v21, %v1184_v6 }
 0x187   : > { %v3583_v11 = vpop.eup %2597  ;;  %v1437_v7 = vmul.f32 1.442695, %v1321_v15  ;;  %v1343_v60 = vmul.f32 1.442695, %v1274_v16 }
 0x188   : > { %1617 = vmatmul.f32.gmra.mxu0 %v3581_v1  ;;  %1679 = vmatmul.f32.gmra.mxu1 %v3583_v11  ;;  %v3588_v56 = vpop.eup %2599  ;;  %v1375_v19 = vmul.f32 1.442695, %v1290_v3 }
 0x189   : > { %2603 = vpow2.f32 %v1437_v7  ;;  %1493 = vadd.xlane.f32.xlu2 %v3469_v2  ;;  %1461 = vadd.xlane.f32.xlu1 %v3473_v31  ;;  %v3596_v15 = vpop.eup %2601 }
 0x18a   : > { %2605 = vpow2.f32 %v1343_v60  ;;  %1747 = vmatmul.f32.gmra.mxu2 %v3588_v56 }
 0x18b   : > { %1525 = vadd.xlane.f32.xlu0 %v3487_v47  ;;  %2607 = vpow2.f32 %v1375_v19 }
 0x18c   : > { %v1216_v20 = vpop.xlane.xlu1 %1215  ;;  %v1248_v17 = vpop.xlane.xlu2 %1247 }
 0x18d   : > { %v1306_v21 = vsub.f32 %v3327_v24, %v1216_v20  ;;  %v1322_v34 = vsub.f32 %v3329_v25, %v1248_v17  ;;  %v1154_v12 = vpop.xlane.xlu0 %1153 }
 0x18e   : > { %v1275_v16 = vsub.f32 %v3331_v26, %v1154_v12 }
 0x18f   : > { %v3599_v2 = vpop.eup %2603  ;;  %v1407_v60 = vmul.f32 1.442695, %v1306_v21  ;;  %v1439_v31 = vmul.f32 1.442695, %v1322_v34 }
 0x190   : > { %v3601_v6 = vpop.eup %2605  ;;  %v1345_v7 = vmul.f32 1.442695, %v1275_v16  ;;  %1682 = vmatmul.f32.gmra.mxu1 %v3596_v15  ;;  %1812 = vmatmul.f32.gmra.mxu3 %v3599_v2 }
 0x191   : > { %2609 = vpow2.f32 %v1407_v60  ;;  %1620 = vmatmul.f32.gmra.mxu0 %v3601_v6  ;;  %1463 = vadd.xlane.f32.xlu2 %v3509_v57  ;;  %v3611_v19 = vpop.eup %2607 }
 0x192   : > { %2611 = vpow2.f32 %v1439_v31  ;;  %1557 = vadd.xlane.f32.xlu1 %v3489_v55 }
 0x193   : > { %2613 = vpow2.f32 %v1345_v7  ;;  %1495 = vadd.xlane.f32.xlu0 %v3505_v38 }
 0x194   : > { %v1186_v24 = vpop.xlane.xlu1 %1185  ;;  %v1218_v25 = vpop.xlane.xlu2 %1217 }
 0x195   : > { %v1291_v26 = vsub.f32 %v3342_v33, %v1186_v24  ;;  %v1307_v47 = vsub.f32 %v3346_v36, %v1218_v25  ;;  %v1250_v3 = vpop.xlane.xlu0 %1249 }
 0x196   : > { %v1323_v20 = vsub.f32 %v3348_v37, %v1250_v3 }
 0x197   : > { %v3614_v17 = vpop.eup %2609  ;;  %v1377_v57 = vmul.f32 1.442695, %v1291_v26  ;;  %v1409_v21 = vmul.f32 1.442695, %v1307_v47 }
 0x198   : > { %v3616_v34 = vpop.eup %2611  ;;  %v1441_v55 = vmul.f32 1.442695, %v1323_v20  ;;  %1685 = vmatmul.f32.gmra.mxu1 %v3611_v19  ;;  %1750 = vmatmul.f32.gmra.mxu2 %v3614_v17 }
 0x199   : > { %v3620_v38 = vpop.eup %2613  ;;  %2615 = vpow2.f32 %v1377_v57  ;;  %1815 = vmatmul.f32.gmra.mxu3 %v3616_v34  ;;  %1559 = vadd.xlane.f32.xlu2 %v3513_v10 }
 0x19a   : > { %2617 = vpow2.f32 %v1409_v21  ;;  %1527 = vadd.xlane.f32.xlu1 %v3527_v44  ;;  %1623 = vmatmul.f32.gmra.mxu0 %v3620_v38 }
 0x19b   : > { %2619 = vpow2.f32 %v1441_v55  ;;  %1465 = vadd.xlane.f32.xlu0 %v3525_v22 }
 0x19c   : > { %v1188_v33 = vpop.xlane.xlu2 %1187  ;;  %v1156_v36 = vpop.xlane.xlu1 %1155 }
 0x19d   : > { %v1292_v37 = vsub.f32 %v3368_v52, %v1188_v33  ;;  %v1276_v12 = vsub.f32 %v3360_v45, %v1156_v36  ;;  %v1220_v16 = vpop.xlane.xlu0 %1219 }
 0x19e   : > { %v1308_v60 = vsub.f32 %v3370_v53, %v1220_v16 }
 0x19f   : > { %v3630_v31 = vpop.eup %2615  ;;  %v1379_v10 = vmul.f32 1.442695, %v1292_v37  ;;  %v1347_v7 = vmul.f32 1.442695, %v1276_v12 }
 0x1a0   : > { %v3632_v24 = vpop.eup %2617  ;;  %v1411_v44 = vmul.f32 1.442695, %v1308_v60  ;;  %1688 = vmatmul.f32.gmra.mxu1 %v3630_v31 }
 0x1a1   : > { %v3635_v25 = vpop.eup %2619  ;;  %2621 = vpow2.f32 %v1379_v10  ;;  %1753 = vmatmul.f32.gmra.mxu2 %v3632_v24  ;;  %1529 = vadd.xlane.f32.xlu2 %v3552_v8 }
 0x1a2   : > { %2623 = vpow2.f32 %v1347_v7  ;;  %1497 = vadd.xlane.f32.xlu1 %v3547_v46  ;;  %1818 = vmatmul.f32.gmra.mxu3 %v3635_v25 }
 0x1a3   : > { %2625 = vpow2.f32 %v1411_v44  ;;  %1561 = vadd.xlane.f32.xlu0 %v3532_v42 }
 0x1a4   : > { %v1252_v45 = vpop.xlane.xlu1 %1251  ;;  %v1158_v52 = vpop.xlane.xlu2 %1157 }
 0x1a5   : > { %v1324_v53 = vsub.f32 %v3384_v4, %v1252_v45  ;;  %v1277_v22 = vsub.f32 %v3387_v23, %v1158_v52  ;;  %v1190_v26 = vpop.xlane.xlu0 %1189 }
 0x1a6   : > { %v1293_v47 = vsub.f32 %v3391_v29, %v1190_v26 }
 0x1a7   : > { %v3645_v3 = vpop.eup %2621  ;;  %v1443_v8 = vmul.f32 1.442695, %v1324_v53  ;;  %v1349_v20 = vmul.f32 1.442695, %v1277_v22 }
 0x1a8   : > { %v3647_v57 = vpop.eup %2623  ;;  %v1381_v46 = vmul.f32 1.442695, %v1293_v47  ;;  %1691 = vmatmul.f32.gmra.mxu1 %v3645_v3 }
 0x1a9   : > { %v3650_v21 = vpop.eup %2625  ;;  %2627 = vpow2.f32 %v1443_v8  ;;  %1626 = vmatmul.f32.gmra.mxu0 %v3647_v57  ;;  %1499 = vadd.xlane.f32.xlu2 %v3583_v11 }
 0x1aa   : > { %2629 = vpow2.f32 %v1349_v20  ;;  %1467 = vadd.xlane.f32.xlu1 %v3562_v5  ;;  %1756 = vmatmul.f32.gmra.mxu2 %v3650_v21 }
 0x1ab   : > { %2631 = vpow2.f32 %v1381_v46  ;;  %1531 = vadd.xlane.f32.xlu0 %v3573_v18 }
 0x1ac   : > { %v1222_v4 = vpop.xlane.xlu1 %1221  ;;  %v1254_v23 = vpop.xlane.xlu2 %1253 }
 0x1ad   : > { %v1309_v29 = vsub.f32 %v3406_v43, %v1222_v4  ;;  %v1325_v42 = vsub.f32 %v3412_v49, %v1254_v23  ;;  %v1160_v55 = vpop.xlane.xlu0 %1159 }
 0x1ae   : > { %v1278_v33 = vsub.f32 %v3414_v50, %v1160_v55 }
 0x1af   : > { %v3660_v36 = vpop.eup %2627  ;;  %v1413_v11 = vmul.f32 1.442695, %v1309_v29  ;;  %v1445_v37 = vmul.f32 1.442695, %v1325_v42 }
 0x1b0   : > { %v3662_v12 = vpop.eup %2629  ;;  %v1351_v5 = vmul.f32 1.442695, %v1278_v33  ;;  %1821 = vmatmul.f32.gmra.mxu3 %v3660_v36 }
 0x1b1   : > { %v3665_v16 = vpop.eup %2631  ;;  %2633 = vpow2.f32 %v1413_v11  ;;  %1629 = vmatmul.f32.gmra.mxu0 %v3662_v12  ;;  %1469 = vadd.xlane.f32.xlu2 %v3581_v1 }
 0x1b2   : > { %2635 = vpow2.f32 %v1445_v37  ;;  %1563 = vadd.xlane.f32.xlu1 %v3568_v32  ;;  %1694 = vmatmul.f32.gmra.mxu1 %v3665_v16 }
 0x1b3   : > { %2637 = vpow2.f32 %v1351_v5  ;;  %1501 = vadd.xlane.f32.xlu0 %v3596_v15 }
 0x1b4   : > { %v1192_v43 = vpop.xlane.xlu1 %1191  ;;  %v1224_v49 = vpop.xlane.xlu2 %1223 }
 0x1b5   : > { %v1294_v50 = vsub.f32 %v3427_v63, %v1192_v43  ;;  %v1310_v18 = vsub.f32 %v3431_v27, %v1224_v49  ;;  %v1256_v60 = vpop.xlane.xlu0 %1255  ;;  %v4134_v49 = vld [vmem:[#allocation5_spill] sm:$0xff] }
 0x1b6   : > { %v1326_v10 = vsub.f32 %v3433_v28, %v1256_v60 }
 0x1b7   : > { %v3675_v7 = vpop.eup %2633  ;;  %v1383_v1 = vmul.f32 1.442695, %v1294_v50  ;;  %v1415_v44 = vmul.f32 1.442695, %v1310_v18 }
 0x1b8   : > { %v3677_v45 = vpop.eup %2635  ;;  %v1447_v32 = vmul.f32 1.442695, %v1326_v10  ;;  %1759 = vmatmul.f32.gmra.mxu2 %v3675_v7 }
 0x1b9   : > { %v3680_v52 = vpop.eup %2637  ;;  %2639 = vpow2.f32 %v1383_v1  ;;  %1824 = vmatmul.f32.gmra.mxu3 %v3677_v45  ;;  %1565 = vadd.xlane.f32.xlu2 %v3599_v2 }
 0x1ba   : > { %2641 = vpow2.f32 %v1415_v44  ;;  %1533 = vadd.xlane.f32.xlu1 %v3588_v56  ;;  %1632 = vmatmul.f32.gmra.mxu0 %v3680_v52 }
 0x1bb   : > { %2643 = vpow2.f32 %v1447_v32  ;;  %1471 = vadd.xlane.f32.xlu0 %v3601_v6 }
 0x1bc   : > { %v1194_v63 = vpop.xlane.xlu2 %1193  ;;  %v1162_v27 = vpop.xlane.xlu1 %1161 }
 0x1bd   : > { %v1295_v28 = vsub.f32 %v3445_v39, %v1194_v63  ;;  %v1279_v15 = vsub.f32 %v3442_v35, %v1162_v27  ;;  %v1226_v53 = vpop.xlane.xlu0 %1225  ;;  %v4136_v63 = vld [vmem:[#allocation8_spill] sm:$0xff] }
 0x1be   : > { %v1311_v22 = vsub.f32 %v3447_v40, %v1226_v53 }
 0x1bf   : > { %v3690_v26 = vpop.eup %2639  ;;  %v1385_v2 = vmul.f32 1.442695, %v1295_v28  ;;  %v1353_v47 = vmul.f32 1.442695, %v1279_v15  ;;  %v4137_v15 = vld [vmem:[#allocation7_spill] sm:$0xff] }
 0x1c0   : > { %v3692_v8 = vpop.eup %2641  ;;  %v1417_v56 = vmul.f32 1.442695, %v1311_v22  ;;  %1697 = vmatmul.f32.gmra.mxu1 %v3690_v26 }
 0x1c1   : > { %v3695_v20 = vpop.eup %2643  ;;  %2645 = vpow2.f32 %v1385_v2  ;;  %1762 = vmatmul.f32.gmra.mxu2 %v3692_v8  ;;  %1535 = vadd.xlane.f32.xlu2 %v3614_v17 }
 0x1c2   : > { %2647 = vpow2.f32 %v1353_v47  ;;  %1503 = vadd.xlane.f32.xlu1 %v3611_v19  ;;  %1827 = vmatmul.f32.gmra.mxu3 %v3695_v20 }
 0x1c3   : > { %2649 = vpow2.f32 %v1417_v56  ;;  %1567 = vadd.xlane.f32.xlu0 %v3616_v34  ;;  %v4138_v56 = vld [vmem:[#allocation9_spill] sm:$0xff] }
 0x1c4   : > { %v1258_v35 = vpop.xlane.xlu1 %1257  ;;  %v1164_v39 = vpop.xlane.xlu2 %1163 }
 0x1c5   : > { %v1327_v40 = vsub.f32 %v3452_v41, %v1258_v35  ;;  %v1280_v6 = vsub.f32 %v3456_v48, %v1164_v39  ;;  %v1196_v46 = vpop.xlane.xlu0 %1195 }
 0x1c6   : > { %v1296_v4 = vsub.f32 %v3458_v51, %v1196_v46  ;;  %v4139_v46 = vld [vmem:[#allocation11_spill] sm:$0xff] }
 0x1c7   : > { %v3705_v23 = vpop.eup %2645  ;;  %v1449_v17 = vmul.f32 1.442695, %v1327_v40  ;;  %v1355_v29 = vmul.f32 1.442695, %v1280_v6 }
 0x1c8   : > { %v3707_v42 = vpop.eup %2647  ;;  %v1387_v19 = vmul.f32 1.442695, %v1296_v4  ;;  %1700 = vmatmul.f32.gmra.mxu1 %v3705_v23 }
 0x1c9   : > { %v3710_v55 = vpop.eup %2649  ;;  %2651 = vpow2.f32 %v1449_v17  ;;  %1635 = vmatmul.f32.gmra.mxu0 %v3707_v42  ;;  %1505 = vadd.xlane.f32.xlu2 %v3630_v31  ;;  %v4140_v17 = vld [vmem:[#allocation10_spill] sm:$0xff] }
 0x1ca   : > { %2653 = vpow2.f32 %v1355_v29  ;;  %1473 = vadd.xlane.f32.xlu1 %v3620_v38  ;;  %1765 = vmatmul.f32.gmra.mxu2 %v3710_v55 }
 0x1cb   : > { %2655 = vpow2.f32 %v1387_v19  ;;  %1537 = vadd.xlane.f32.xlu0 %v3632_v24 }
 0x1cc   : > { %v1228_v41 = vpop.xlane.xlu1 %1227  ;;  %v1260_v48 = vpop.xlane.xlu2 %1259 }
 0x1cd   : > { %v1312_v51 = vsub.f32 %v3463_v59, %v1228_v41  ;;  %v1328_v34 = vsub.f32 %v3467_v61, %v1260_v48  ;;  %v1166_v33 = vpop.xlane.xlu0 %1165 }
 0x1ce   : > { %v1281_v31 = vsub.f32 %v3471_v30, %v1166_v33 }
 0x1cf   : > { %v3719_v11 = vpop.eup %2651  ;;  %v1419_v37 = vmul.f32 1.442695, %v1312_v51  ;;  %v1451_v5 = vmul.f32 1.442695, %v1328_v34 }
 0x1d0   : > { %v3722_v43 = vpop.eup %2653  ;;  %1830 = vmatmul.f32.gmra.mxu3 %v3719_v11  ;;  %v1357_v24 = vmul.f32 1.442695, %v1281_v31 }
 0x1d1   : > { %v3725_v38 = vpop.eup %2655  ;;  %2657 = vpow2.f32 %v1419_v37  ;;  %1638 = vmatmul.f32.gmra.mxu0 %v3722_v43  ;;  %1475 = vadd.xlane.f32.xlu2 %v3647_v57  ;;  %v4135_v57 = vld [vmem:[#allocation6_spill] sm:$0xff] }
 0x1d2   : > { %2659 = vpow2.f32 %v1451_v5  ;;  %1569 = vadd.xlane.f32.xlu1 %v3635_v25  ;;  %1703 = vmatmul.f32.gmra.mxu1 %v3725_v38 }
 0x1d3   : > { %2661 = vpow2.f32 %v1357_v24  ;;  %1507 = vadd.xlane.f32.xlu0 %v3645_v3 }
 0x1d4   : > { %v1198_v59 = vpop.xlane.xlu1 %1197  ;;  %v1230_v61 = vpop.xlane.xlu2 %1229 }
 0x1d5   : > { %v1297_v30 = vsub.f32 %v3480_v0, %v1198_v59  ;;  %v1313_v50 = vsub.f32 %v4134_v49, %v1230_v61  ;;  %v1262_v18 = vpop.xlane.xlu0 %1261 }
 0x1d6   : > { %v1329_v44 = vsub.f32 %v4135_v57, %v1262_v18 }
 0x1d7   : > { %v3734_v60 = vpop.eup %2657  ;;  %v1389_v10 = vmul.f32 1.442695, %v1297_v30  ;;  %v1421_v1 = vmul.f32 1.442695, %v1313_v50 }
 0x1d8   : > { %v3737_v32 = vpop.eup %2659  ;;  %1768 = vmatmul.f32.gmra.mxu2 %v3734_v60  ;;  %v1453_v3 = vmul.f32 1.442695, %v1329_v44 }
 0x1d9   : > { %v3740_v25 = vpop.eup %2661  ;;  %2663 = vpow2.f32 %v1389_v10  ;;  %1833 = vmatmul.f32.gmra.mxu3 %v3737_v32  ;;  %1571 = vadd.xlane.f32.xlu2 %v3660_v36 }
 0x1da   : > { %2665 = vpow2.f32 %v1421_v1  ;;  %1539 = vadd.xlane.f32.xlu1 %v3650_v21  ;;  %1641 = vmatmul.f32.gmra.mxu0 %v3740_v25 }
 0x1db   : > { %2667 = vpow2.f32 %v1453_v3  ;;  %1477 = vadd.xlane.f32.xlu0 %v3662_v12 }
 0x1dc   : > { %v1200_v0 = vpop.xlane.xlu2 %1199  ;;  %v1168_v28 = vpop.xlane.xlu1 %1167 }
 0x1dd   : > { %v1298_v27 = vsub.f32 %v4136_v63, %v1200_v0  ;;  %v1282_v53 = vsub.f32 %v4137_v15, %v1168_v28  ;;  %v1232_v22 = vpop.xlane.xlu0 %1231 }
 0x1de   : > { %v1314_v36 = vsub.f32 %v4138_v56, %v1232_v22 }
 0x1df   : > { %v3749_v2 = vpop.eup %2663  ;;  %v1391_v47 = vmul.f32 1.442695, %v1298_v27  ;;  %v1359_v21 = vmul.f32 1.442695, %v1282_v53 }
 0x1e0   : > { %v3752_v35 = vpop.eup %2665  ;;  %1706 = vmatmul.f32.gmra.mxu1 %v3749_v2  ;;  %v1423_v12 = vmul.f32 1.442695, %v1314_v36 }
 0x1e1   : > { %v3755_v39 = vpop.eup %2667  ;;  %2669 = vpow2.f32 %v1391_v47  ;;  %1771 = vmatmul.f32.gmra.mxu2 %v3752_v35  ;;  %1541 = vadd.xlane.f32.xlu2 %v3675_v7  ;;  %v1671_v47 = vpop.f32.mrf.mxu1 }
 0x1e2   : > { %2671 = vpow2.f32 %v1359_v21  ;;  %1509 = vadd.xlane.f32.xlu1 %v3665_v16  ;;  %1836 = vmatmul.f32.gmra.mxu3 %v3755_v39 }
 0x1e3   : > { %2673 = vpow2.f32 %v1423_v12  ;;  %1573 = vadd.xlane.f32.xlu0 %v3677_v45 }
 0x1e4   : > { %v1170_v40 = vpop.xlane.xlu2 %1169  ;;  %v1264_v6 = vpop.xlane.xlu1 %1263 }
 0x1e5   : > { %v1283_v4 = vsub.f32 %v4139_v46, %v1170_v40  ;;  %v1330_v29 = vsub.f32 %v4140_v17, %v1264_v6 }
 0x1e6   : > { %v1202_v48 = vpop.xlane.xlu0 %1201 }
 0x1e7   : > { %v3764_v19 = vpop.eup %2669  ;;  %v1361_v41 = vmul.f32 1.442695, %v1283_v4  ;;  %v1455_v7 = vmul.f32 1.442695, %v1330_v29  ;;  %v1299_v16 = vsub.f32 %v3530_v54, %v1202_v48  ;;  %v1801_v4 = vpop.f32.mrf.mxu3 }
 0x1e8   : > { %v3766_v51 = vpop.eup %2671  ;;  %1709 = vmatmul.f32.gmra.mxu1 %v3764_v19 }
 0x1e9   : > { %v3770_v34 = vpop.eup %2673  ;;  %2675 = vpow2.f32 %v1361_v41  ;;  %1644 = vmatmul.f32.gmra.mxu0 %v3766_v51  ;;  %1511 = vadd.xlane.f32.xlu2 %v3690_v26  ;;  %v1393_v45 = vmul.f32 1.442695, %v1299_v16 }
 0x1ea   : > { %2677 = vpow2.f32 %v1455_v7  ;;  %1479 = vadd.xlane.f32.xlu1 %v3680_v52  ;;  %1774 = vmatmul.f32.gmra.mxu2 %v3770_v34 }
 0x1eb   : > { %2679 = vpow2.f32 %v1393_v45  ;;  %1543 = vadd.xlane.f32.xlu0 %v3692_v8 }
 0x1ec   : > { %v1266_v33 = vpop.xlane.xlu2 %1265  ;;  %v1234_v54 = vpop.xlane.xlu1 %1233 }
 0x1ed   : > { %v1331_v37 = vsub.f32 %v3544_v62, %v1266_v33  ;;  %v1315_v5 = vsub.f32 %v3538_v9, %v1234_v54 }
 0x1ee   : > { %v1172_v59 = vpop.xlane.xlu0 %1171 }
 0x1ef   : > { %v3779_v31 = vpop.eup %2675  ;;  %v1457_v24 = vmul.f32 1.442695, %v1331_v37  ;;  %v1425_v61 = vmul.f32 1.442695, %v1315_v5  ;;  %v1284_v30 = vsub.f32 %v3550_v13, %v1172_v59  ;;  %v4141_v13 = vld [vmem:[#allocation12_spill] sm:$0xff]  ;;  %v1804_v45 = vpop.f32.mrf.mxu3 }
 0x1f0   : > { %v2678_v26 = vpop.eup %2677 }
 0x1f1   : > { %2681 = vpow2.f32 %v1457_v24  ;;  %1647 = vmatmul.f32.gmra.mxu0 %v3779_v31  ;;  %1839 = vmatmul.f32.gmra.mxu3 %v2678_v26  ;;  %v2680_v52 = vpop.eup %2679  ;;  %v1363_v8 = vmul.f32 1.442695, %v1284_v30 }
 0x1f2   : > { %2683 = vpow2.f32 %v1425_v61  ;;  %1575 = vadd.xlane.f32.xlu1 %v3695_v20  ;;  %1481 = vadd.xlane.f32.xlu2 %v3707_v42 }
 0x1f3   : > { %1712 = vmatmul.f32.gmra.mxu1 %v2680_v52  ;;  %2685 = vpow2.f32 %v1363_v8  ;;  %1513 = vadd.xlane.f32.xlu0 %v3705_v23 }
 0x1f4   : > { %v1236_v62 = vpop.xlane.xlu2 %1235  ;;  %v1204_v9 = vpop.xlane.xlu1 %1203 }
 0x1f5   : > { %v1316_v49 = vsub.f32 %v3560_v58, %v1236_v62  ;;  %v1300_v50 = vsub.f32 %v4141_v13, %v1204_v9 }
 0x1f6   : > { %v1268_v1 = vpop.xlane.xlu0 %1267 }
 0x1f7   : > { %v2682_v18 = vpop.eup %2681  ;;  %v1427_v10 = vmul.f32 1.442695, %v1316_v49  ;;  %v1395_v44 = vmul.f32 1.442695, %v1300_v50  ;;  %v1332_v3 = vsub.f32 %v3571_v14, %v1268_v1  ;;  %v1807_v62 = vpop.f32.mrf.mxu3 }
 0x1f8   : > { %v2684_v57 = vpop.eup %2683 }
 0x1f9   : > { %2687 = vpow2.f32 %v1427_v10  ;;  %1777 = vmatmul.f32.gmra.mxu2 %v2684_v57  ;;  %1842 = vmatmul.f32.gmra.mxu3 %v2682_v18  ;;  %v2686_v20 = vpop.eup %2685  ;;  %v1459_v42 = vmul.f32 1.442695, %v1332_v3 }
 0x1fa   : > { %2689 = vpow2.f32 %v1395_v44  ;;  %1545 = vadd.xlane.f32.xlu1 %v3710_v55  ;;  %1577 = vadd.xlane.f32.xlu2 %v3719_v11 }
 0x1fb   : > { %1650 = vmatmul.f32.gmra.mxu0 %v2686_v20  ;;  %2691 = vpow2.f32 %v1459_v42  ;;  %1483 = vadd.xlane.f32.xlu0 %v3722_v43 }
 0x1fc   : > { %v1494_v58 = vpop.xlane.xlu2 %1493  ;;  %v3792_v23 = vpop.xlane.xlu1 %1461 }
 0x1fe   : > { %v1526_v63 = vpop.xlane.xlu0 %1525 }
 0x1ff   : > { %v2688_v0 = vpop.eup %2687 }
 0x200   : > { %v2690_v14 = vpop.eup %2689 }
 0x201   : > { %1715 = vmatmul.f32.gmra.mxu1 %v2690_v14  ;;  %1780 = vmatmul.f32.gmra.mxu2 %v2688_v0  ;;  %v2692_v27 = vpop.eup %2691 }
 0x202   : > { %1515 = vadd.xlane.f32.xlu1 %v3725_v38  ;;  %1547 = vadd.xlane.f32.xlu2 %v3734_v60 }
 0x203   : > { %1845 = vmatmul.f32.gmra.mxu3 %v2692_v27  ;;  %1579 = vadd.xlane.f32.xlu0 %v3737_v32 }
 0x204   : > { %v3797_v55 = vpop.xlane.xlu2 %1463 }
 0x205   : > { %v1558_v11 = vpop.xlane.xlu1 %1557 }
 0x206   : > { %v1496_v43 = vpop.xlane.xlu0 %1495 }
 0x207   : > { %2693 = vrcp.f32 %v1496_v43 }
 0x208   : > { %2695 = vrcp.f32 %v1494_v58 }
 0x209   : > { %2697 = vrcp.f32 %v1526_v63 }
 0x20a   : > { %1485 = vadd.xlane.f32.xlu1 %v3740_v25  ;;  %1517 = vadd.xlane.f32.xlu2 %v3749_v2  ;;  %2699 = vrcp.f32 %v1558_v11 }
 0x20b   : > { %1549 = vadd.xlane.f32.xlu0 %v3752_v35  ;;  %v1736_v35 = vpop.f32.mrf.mxu2 }
 0x20c   : > { %v3802_v28 = vpop.xlane.xlu2 %1559 }
 0x20d   : > { %v3804_v15 = vpop.xlane.xlu1 %1527 }
 0x20e   : > { %v3806_v38 = vpop.xlane.xlu0 %1465 }
 0x212   : > { %1581 = vadd.xlane.f32.xlu1 %v3755_v39  ;;  %1487 = vadd.xlane.f32.xlu2 %v3766_v51  ;;  %v1674_v39 = vpop.f32.mrf.mxu1  ;;  %v2694_v51 = vpop.eup %2693 }
 0x213   : > { %1519 = vadd.xlane.f32.xlu0 %v3764_v19  ;;  %v1739_v6 = vpop.f32.mrf.mxu2  ;;  %v1930_v54 = vmul.f32 %v2694_v51, %v1674_v39 }
 0x214   : > { %v3811_v60 = vpop.xlane.xlu2 %1529 }
 0x215   : > { %v1498_v32 = vpop.xlane.xlu1 %1497 }
 0x216   : > { %v1562_v25 = vpop.xlane.xlu0 %1561  ;;  %2701 = vrcp.f32 %v1498_v32 }
 0x217   : > { %2703 = vrcp.f32 %v1562_v25 }
 0x218   : > { %2705 = vrcp.f32 %v3804_v15 }
 0x219   : > { %2707 = vrcp.f32 %v3802_v28 }
 0x21a   : > { %1551 = vadd.xlane.f32.xlu1 %v3770_v34  ;;  %1583 = vadd.xlane.f32.xlu2 %v2678_v26  ;;  %v1677_v17 = vpop.f32.mrf.mxu1  ;;  %v2696_v34 = vpop.eup %2695 }
 0x21b   : > { %1489 = vadd.xlane.f32.xlu0 %v3779_v31  ;;  %v3837_v48 = vpop.f32.mrf.mxu2  ;;  %v1929_v5 = vmul.f32 %v2696_v34, %v1671_v47  ;;  %v2698_v31 = vpop.eup %2697 }
 0x21c   : > { %v3815_v53 = vpop.xlane.xlu2 %1499  ;;  %v2700_v26 = vpop.eup %2699  ;;  %v1945_v8 = vmul.f32 %v2698_v31, %v1736_v35 }
 0x21d   : > { %v3817_v22 = vpop.xlane.xlu1 %1467  ;;  %v2702_v30 = vpop.eup %2701  ;;  %v1961_v49 = vmul.f32 %v2700_v26, %v1801_v4 }
 0x21e   : > { %v3819_v2 = vpop.xlane.xlu0 %1531  ;;  %v1931_v13 = vmul.f32 %v2702_v30, %v1677_v17  ;;  %v2704_v50 = vpop.eup %2703 }
 0x21f   : > { %v2706_v10 = vpop.eup %2705  ;;  %v1963_v3 = vmul.f32 %v2704_v50, %v1807_v62 }
 0x220   : > { %v2708_v44 = vpop.eup %2707 }
 0x221   : > { %v1962_v63 = vmul.f32 %v2708_v44, %v1804_v45 }
 0x222   : > { %1521 = vadd.xlane.f32.xlu1 %v2680_v52  ;;  %1553 = vadd.xlane.f32.xlu2 %v2684_v57  ;;  %v3839_v7 = vpop.f32.mrf.mxu1 }
 0x223   : > { %1585 = vadd.xlane.f32.xlu0 %v2682_v18  ;;  %v1745_v24 = vpop.f32.mrf.mxu2 }
 0x224   : > { %v3821_v56 = vpop.xlane.xlu2 %1469 }
 0x225   : > { %v3823_v36 = vpop.xlane.xlu1 %1563 }
 0x226   : > { %v1502_v21 = vpop.xlane.xlu0 %1501 }
 0x227   : > { %2709 = vrcp.f32 %v1502_v21 }
 0x228   : > { %2711 = vrcp.f32 %v3815_v53 }
 0x229   : > { %2713 = vrcp.f32 %v3811_v60 }
 0x22a   : > { %1523 = vadd.xlane.f32.xlu2 %v2690_v14  ;;  %1491 = vadd.xlane.f32.xlu1 %v2686_v20  ;;  %v1683_v52 = vpop.f32.mrf.mxu1  ;;  %v1810_v20 = vpop.f32.mrf.mxu3  ;;  %2715 = vrcp.f32 %v3819_v2 }
 0x22b   : > { %1555 = vadd.xlane.f32.xlu0 %v2688_v0  ;;  %v3862_v1 = vpop.f32.mrf.mxu2  ;;  %v1946_v0 = vmul.f32 %v2706_v10, %v1739_v6  ;;  %2717 = vrcp.f32 %v3823_v36 }
 0x22c   : > { %v3825_v12 = vpop.xlane.xlu2 %1565 }
 0x22d   : > { %v3827_v40 = vpop.xlane.xlu1 %1533  ;;  %v2710_v14 = vpop.eup %2709  ;;  %2719 = vrcp.f32 %v3825_v12 }
 0x22e   : > { %v3829_v46 = vpop.xlane.xlu0 %1471  ;;  %v2712_v11 = vpop.eup %2711  ;;  %v1933_v60 = vmul.f32 %v2710_v14, %v1683_v52 }
 0x22f   : > { %v2714_v15 = vpop.eup %2713  ;;  %v1932_v53 = vmul.f32 %v2712_v11, %v3839_v7 }
 0x230   : > { %v1947_v47 = vmul.f32 %v2714_v15, %v3837_v48  ;;  %v2716_v2 = vpop.eup %2715 }
 0x231   : > { %v2718_v39 = vpop.eup %2717  ;;  %v1948_v12 = vmul.f32 %v2716_v2, %v1745_v24 }
 0x232   : > { %1587 = vadd.xlane.f32.xlu1 %v2692_v27  ;;  %v1686_v58 = vpop.f32.mrf.mxu1  ;;  %v1813_v32 = vpop.f32.mrf.mxu3  ;;  %v1964_v48 = vmul.f32 %v2718_v39, %v1810_v20 }
 0x233   : > { %v3875_v43 = vpop.f32.mrf.mxu2  ;;  %v2720_v6 = vpop.eup %2719 }
 0x234   : > { %v3831_v29 = vpop.xlane.xlu2 %1535  ;;  %v1965_v7 = vmul.f32 %v2720_v6, %v1813_v32 }
 0x235   : > { %v3833_v19 = vpop.xlane.xlu1 %1503 }
 0x236   : > { %v3835_v41 = vpop.xlane.xlu0 %1567 }
 0x237   : > { %2721 = vrcp.f32 %v3835_v41 }
 0x238   : > { %2723 = vrcp.f32 %v3833_v19 }
 0x23a   : > { %v1689_v35 = vpop.f32.mrf.mxu1  ;;  %v1816_v51 = vpop.f32.mrf.mxu3 }
 0x23b   : > { %v1754_v4 = vpop.f32.mrf.mxu2 }
 0x23c   : > { %v3841_v16 = vpop.xlane.xlu2 %1505 }
 0x23d   : > { %v3843_v33 = vpop.xlane.xlu1 %1473  ;;  %2725 = vrcp.f32 %v3841_v16  ;;  %v2722_v34 = vpop.eup %2721 }
 0x23e   : > { %v3845_v37 = vpop.xlane.xlu0 %1537  ;;  %v2724_v45 = vpop.eup %2723  ;;  %v1966_v16 = vmul.f32 %v2722_v34, %v1816_v51 }
 0x23f   : > { %1995 = vrot.lane.b32.xlu0 %v1930_v54, %s2901_s10  ;;  %v1934_v26 = vmul.f32 %v2724_v45, %v1686_v58 }
 0x242   : > { %1993 = vrot.lane.b32.xlu2 %v1929_v5, %s2901_s10  ;;  %v1692_v41 = vpop.f32.mrf.mxu1  ;;  %v1819_v30 = vpop.f32.mrf.mxu3 }
 0x243   : > { %v2726_v5 = vpop.eup %2725  ;;  %v3905_v31 = vpop.f32.mrf.mxu2 }
 0x244   : > { %v3849_v59 = vpop.xlane.xlu2 %1475  ;;  %v1935_v52 = vmul.f32 %v2726_v5, %v1689_v35 }
 0x245   : > { %v3851_v61 = vpop.xlane.xlu1 %1569 }
 0x246   : > { %v3854_v9 = vpop.xlane.xlu0 %1507 }
 0x247   : > { %2057 = vrot.lane.b32.xlu0 %v1945_v8, %s2902_s11  ;;  %2727 = vrcp.f32 %v3854_v9 }
 0x248   : > { %2729 = vrcp.f32 %v3827_v40 }
 0x249   : > { %2731 = vrcp.f32 %v3831_v29 }
 0x24a   : > { %2121 = vrot.lane.b32.xlu2 %v1961_v49, %s2903_s18  ;;  %v1695_v62 = vpop.f32.mrf.mxu1  ;;  %2733 = vrcp.f32 %v3845_v37 }
 0x24b   : > { %1997 = vrot.lane.b32.xlu1 %v1931_v13, %s2901_s10  ;;  %v1760_v29 = vpop.f32.mrf.mxu2  ;;  %2735 = vrcp.f32 %v3851_v61 }
 0x24c   : > { %v3860_v18 = vpop.xlane.xlu2 %1571 }
 0x24d   : > { %v3864_v57 = vpop.xlane.xlu1 %1539  ;;  %v2728_v8 = vpop.eup %2727  ;;  %2737 = vrcp.f32 %v3860_v18 }
 0x24e   : > { %v3867_v42 = vpop.xlane.xlu0 %1477  ;;  %v2730_v9 = vpop.eup %2729  ;;  %v1936_v50 = vmul.f32 %v2728_v8, %v1692_v41 }
 0x24f   : > { %2125 = vrot.lane.b32.xlu0 %v1963_v3, %s2903_s18  ;;  %v2732_v49 = vpop.eup %2731  ;;  %v1949_v44 = vmul.f32 %v2730_v9, %v3862_v1  ;;  %v1822_v3 = vpop.f32.mrf.mxu3 }
 0x250   : > { %v1950_v20 = vmul.f32 %v2732_v49, %v3875_v43  ;;  %v2734_v37 = vpop.eup %2733 }
 0x251   : > { %v1951_v18 = vmul.f32 %v2734_v37, %v1754_v4 }
 0x252   : > { %2059 = vrot.lane.b32.xlu2 %v1946_v0, %s2902_s11  ;;  %v1698_v58 = vpop.f32.mrf.mxu1  ;;  %v2736_v0 = vpop.eup %2735 }
 0x253   : > { %2123 = vrot.lane.b32.xlu1 %v1962_v63, %s2903_s18  ;;  %v2738_v63 = vpop.eup %2737  ;;  %v1967_v11 = vmul.f32 %v2736_v0, %v1819_v30  ;;  %v1763_v43 = vpop.f32.mrf.mxu2 }
 0x254   : > { %v3873_v27 = vpop.xlane.xlu2 %1541  ;;  %v1968_v15 = vmul.f32 %v2738_v63, %v1822_v3 }
 0x255   : > { %v3878_v28 = vpop.xlane.xlu1 %1509 }
 0x256   : > { %v3881_v25 = vpop.xlane.xlu0 %1573 }
 0x257   : > { %2001 = vrot.lane.b32.xlu0 %v1933_v60, %s2901_s10  ;;  %2739 = vrcp.f32 %v3881_v25  ;;  %v1825_v32 = vpop.f32.mrf.mxu3 }
 0x258   : > { %2741 = vrcp.f32 %v3878_v28 }
 0x25a   : > { %1999 = vrot.lane.b32.xlu2 %v1932_v53, %s2901_s10  ;;  %v1701_v35 = vpop.f32.mrf.mxu1 }
 0x25b   : > { %2061 = vrot.lane.b32.xlu1 %v1947_v47, %s2902_s11  ;;  %v3935_v39 = vpop.f32.mrf.mxu2 }
 0x25c   : > { %v1512_v21 = vpop.xlane.xlu2 %1511 }
 0x25d   : > { %v3890_v36 = vpop.xlane.xlu1 %1479  ;;  %2743 = vrcp.f32 %v1512_v21  ;;  %v2740_v60 = vpop.eup %2739 }
 0x25e   : > { %v3893_v17 = vpop.xlane.xlu0 %1543  ;;  %v2742_v25 = vpop.eup %2741  ;;  %v1969_v28 = vmul.f32 %v2740_v60, %v1825_v32 }
 0x25f   : > { %2063 = vrot.lane.b32.xlu0 %v1948_v12, %s2902_s11  ;;  %v1937_v21 = vmul.f32 %v2742_v25, %v1695_v62 }
 0x262   : > { %2127 = vrot.lane.b32.xlu2 %v1964_v48, %s2903_s18  ;;  %v1828_v48 = vpop.f32.mrf.mxu3 }
 0x263   : > { %2129 = vrot.lane.b32.xlu1 %v1965_v7, %s2903_s18  ;;  %v2744_v47 = vpop.eup %2743  ;;  %v1704_v7 = vpop.f32.mrf.mxu1 }
 0x264   : > { %v1938_v6 = vmul.f32 %v2744_v47, %v1698_v58  ;;  %v1769_v5 = vpop.f32.mrf.mxu2 }
 0x265   : > { %v3900_v54 = vpop.xlane.xlu1 %1575  ;;  %v3902_v19 = vpop.xlane.xlu2 %1481 }
 0x266   : > { %v1514_v24 = vpop.xlane.xlu0 %1513 }
 0x267   : > { %2131 = vrot.lane.b32.xlu0 %v1966_v16, %s2903_s18  ;;  %2745 = vrcp.f32 %v1514_v24 }
 0x268   : > { %2747 = vrcp.f32 %v3864_v57 }
 0x269   : > { %2749 = vrcp.f32 %v3873_v27 }
 0x26a   : > { %2003 = vrot.lane.b32.xlu2 %v1934_v26, %s2901_s10  ;;  %2751 = vrcp.f32 %v3893_v17  ;;  %v1831_v26 = vpop.f32.mrf.mxu3 }
 0x26b   : > { %2005 = vrot.lane.b32.xlu1 %v1935_v52, %s2901_s10  ;;  %2753 = vrcp.f32 %v3900_v54  ;;  %v1707_v8 = vpop.f32.mrf.mxu1 }
 0x26d   : > { %v1578_v40 = vpop.xlane.xlu2 %1577  ;;  %v3912_v13 = vpop.xlane.xlu1 %1545 }
 0x26e   : > { %v3915_v10 = vpop.xlane.xlu0 %1483  ;;  %v2746_v4 = vpop.eup %2745  ;;  %2755 = vrcp.f32 %v1578_v40 }
 0x26f   : > { %2007 = vrot.lane.b32.xlu0 %v1936_v50, %s2901_s10  ;;  %v2748_v51 = vpop.eup %2747  ;;  %v1939_v34 = vmul.f32 %v2746_v4, %v1701_v35  ;;  %v1772_v50 = vpop.f32.mrf.mxu2 }
 0x270   : > { %v2750_v27 = vpop.eup %2749  ;;  %v1952_v45 = vmul.f32 %v2748_v51, %v3905_v31 }
 0x271   : > { %v1953_v16 = vmul.f32 %v2750_v27, %v1760_v29  ;;  %v2752_v24 = vpop.eup %2751 }
 0x272   : > { %2065 = vrot.lane.b32.xlu2 %v1949_v44, %s2902_s11  ;;  %v2754_v30 = vpop.eup %2753  ;;  %v1954_v62 = vmul.f32 %v2752_v24, %v1763_v43  ;;  %v1834_v44 = vpop.f32.mrf.mxu3 }
 0x273   : > { %2067 = vrot.lane.b32.xlu1 %v1950_v20, %s2902_s11  ;;  %v1970_v31 = vmul.f32 %v2754_v30, %v1828_v48  ;;  %v1710_v0 = vpop.f32.mrf.mxu1  ;;  %v3963_v43 = vpop.f32.mrf.mxu0 }
 0x274   : > { %v2756_v54 = vpop.eup %2755 }
 0x275   : > { %v3924_v61 = vpop.xlane.xlu2 %1547  ;;  %v1516_v1 = vpop.xlane.xlu1 %1515  ;;  %v1971_v40 = vmul.f32 %v2756_v54, %v1831_v26 }
 0x276   : > { %v1580_v14 = vpop.xlane.xlu0 %1579 }
 0x277   : > { %2069 = vrot.lane.b32.xlu0 %v1951_v18, %s2902_s11  ;;  %2757 = vrcp.f32 %v1580_v14 }
 0x278   : > { %2759 = vrcp.f32 %v1516_v1 }
 0x27a   : > { %2133 = vrot.lane.b32.xlu2 %v1967_v11, %s2903_s18  ;;  %v3960_v11 = vpop.f32.mrf.mxu2 }
 0x27b   : > { %2135 = vrot.lane.b32.xlu1 %v1968_v15, %s2903_s18  ;;  %v1713_v32 = vpop.f32.mrf.mxu1 }
 0x27d   : > { %v1518_v53 = vpop.xlane.xlu2 %1517  ;;  %v3937_v12 = vpop.xlane.xlu1 %1485 }
 0x27e   : > { %v3931_v2 = vpop.xlane.xlu0 %1549  ;;  %2761 = vrcp.f32 %v1518_v53  ;;  %v2758_v49 = vpop.eup %2757 }
 0x27f   : > { %2137 = vrot.lane.b32.xlu0 %v1969_v28, %s2903_s18  ;;  %v2760_v29 = vpop.eup %2759  ;;  %v1972_v58 = vmul.f32 %v2758_v49, %v1834_v44 }
 0x280   : > { %v1940_v18 = vmul.f32 %v2760_v29, %v1704_v7 }
 0x282   : > { %2009 = vrot.lane.b32.xlu2 %v1937_v21, %s2901_s10  ;;  %v1837_v21 = vpop.f32.mrf.mxu3 }
 0x283   : > { %2011 = vrot.lane.b32.xlu1 %v1938_v6, %s2901_s10  ;;  %v1778_v6 = vpop.f32.mrf.mxu2  ;;  %v1716_v7 = vpop.f32.mrf.mxu1 }
 0x284   : > { %v2762_v20 = vpop.eup %2761 }
 0x285   : > { %v3942_v57 = vpop.xlane.xlu2 %1487  ;;  %v1582_v17 = vpop.xlane.xlu1 %1581  ;;  %v1941_v14 = vmul.f32 %v2762_v20, %v1707_v8 }
 0x286   : > { %v1520_v41 = vpop.xlane.xlu0 %1519 }
 0x287   : > { %2013 = vrot.lane.b32.xlu0 %v1939_v34, %s2901_s10  ;;  %2763 = vrcp.f32 %v1520_v41 }
 0x288   : > { %2765 = vrcp.f32 %v3912_v13 }
 0x289   : > { %2767 = vrcp.f32 %v3924_v61 }
 0x28a   : > { %2071 = vrot.lane.b32.xlu2 %v1952_v45, %s2902_s11  ;;  %2769 = vrcp.f32 %v3931_v2  ;;  %v3970_v2 = vpop.f32.mrf.mxu0 }
 0x28b   : > { %2073 = vrot.lane.b32.xlu1 %v1953_v16, %s2902_s11  ;;  %2771 = vrcp.f32 %v1582_v17  ;;  %v1781_v24 = vpop.f32.mrf.mxu2 }
 0x28d   : > { %v3949_v52 = vpop.xlane.xlu2 %1583  ;;  %v1552_v37 = vpop.xlane.xlu1 %1551 }
 0x28e   : > { %v3951_v9 = vpop.xlane.xlu0 %1489  ;;  %v2764_v1 = vpop.eup %2763 }
 0x28f   : > { %2075 = vrot.lane.b32.xlu0 %v1954_v62, %s2902_s11  ;;  %v2766_v15 = vpop.eup %2765  ;;  %v1942_v61 = vmul.f32 %v2764_v1, %v1710_v0 }
 0x290   : > { %v2768_v60 = vpop.eup %2767  ;;  %v1955_v53 = vmul.f32 %v2766_v15, %v3935_v39 }
 0x291   : > { %v1956_v47 = vmul.f32 %v2768_v60, %v1769_v5  ;;  %v2770_v28 = vpop.eup %2769  ;;  %v1840_v5 = vpop.f32.mrf.mxu3 }
 0x292   : > { %2139 = vrot.lane.b32.xlu2 %v1970_v31, %s2903_s18  ;;  %v2772_v4 = vpop.eup %2771  ;;  %v1957_v27 = vmul.f32 %v2770_v28, %v1772_v50  ;;  %v1612_v30 = vpop.f32.mrf.mxu0 }
 0x293   : > { %2141 = vrot.lane.b32.xlu1 %v1971_v40, %s2903_s18  ;;  %v1973_v39 = vmul.f32 %v2772_v4, %v1837_v21 }
 0x295   : > { %v1554_v3 = vpop.xlane.xlu2 %1553  ;;  %v1522_v25 = vpop.xlane.xlu1 %1521 }
 0x296   : > { %v1586_v63 = vpop.xlane.xlu0 %1585 }
 0x297   : > { %2143 = vrot.lane.b32.xlu0 %v1972_v58, %s2903_s18 }
 0x29a   : > { %2015 = vrot.lane.b32.xlu2 %v1940_v18, %s2901_s10  ;;  %v1615_v20 = vpop.f32.mrf.mxu0 }
 0x29b   : > { %2017 = vrot.lane.b32.xlu1 %v1941_v14, %s2901_s10 }
 0x29d   : > { %v1524_v13 = vpop.xlane.xlu2 %1523  ;;  %v3973_v41 = vpop.xlane.xlu1 %1491 }
 0x29e   : > { %2773 = vrcp.f32 %v1524_v13  ;;  %v1556_v35 = vpop.xlane.xlu0 %1555 }
 0x29f   : > { %2019 = vrot.lane.b32.xlu0 %v1942_v61, %s2901_s10  ;;  %2775 = vrcp.f32 %v1556_v35 }
 0x2a0   : > { %2777 = vrcp.f32 %v1522_v25 }
 0x2a1   : > { %2779 = vrcp.f32 %v1554_v3 }
 0x2a2   : > { %2077 = vrot.lane.b32.xlu2 %v1955_v53, %s2902_s11  ;;  %2781 = vrcp.f32 %v1586_v63  ;;  %v1618_v60 = vpop.f32.mrf.mxu0 }
 0x2a3   : > { %2079 = vrot.lane.b32.xlu1 %v1956_v47, %s2902_s11  ;;  %2783 = vrcp.f32 %v3792_v23  ;;  %v1843_v23 = vpop.f32.mrf.mxu3 }
 0x2a4   : > { %v2774_v51 = vpop.eup %2773  ;;  %2785 = vrcp.f32 %v1552_v37 }
 0x2a5   : > { %v1994_v48 = vpop.permute.xlu2 %1993  ;;  %v1944_v34 = vmul.f32 %v2774_v51, %v1716_v7  ;;  %v2776_v45 = vpop.eup %2775  ;;  %2787 = vrcp.f32 %v3949_v52 }
 0x2a6   : > { %v2778_v16 = vpop.eup %2777  ;;  %v1960_v54 = vmul.f32 %v2776_v45, %v1781_v24  ;;  %v1588_v50 = vpop.xlane.xlu1 %1587 }
 0x2a7   : > { %2081 = vrot.lane.b32.xlu0 %v1957_v27, %s2902_s11  ;;  %v2780_v17 = vpop.eup %2779  ;;  %v1943_v8 = vmul.f32 %v2778_v16, %v1713_v32  ;;  %2789 = vrcp.f32 %v1588_v50 }
 0x2a8   : > { %v1959_v62 = vmul.f32 %v2780_v17, %v1778_v6  ;;  %v2782_v40 = vpop.eup %2781  ;;  %2791 = vrcp.f32 %v3797_v55 }
 0x2a9   : > { %v2784_v49 = vpop.eup %2783  ;;  %v1975_v52 = vmul.f32 %v2782_v40, %v1843_v23  ;;  %2793 = vrcp.f32 %v3806_v38 }
 0x2aa   : > { %2145 = vrot.lane.b32.xlu2 %v1973_v39, %s2903_s18  ;;  %v2786_v29 = vpop.eup %2785  ;;  %v1913_v37 = vmul.f32 %v2784_v49, %v3963_v43  ;;  %2795 = vrcp.f32 %v3817_v22  ;;  %v1621_v4 = vpop.f32.mrf.mxu0 }
 0x2ab   : > { %2023 = vrot.lane.b32.xlu1 %v1944_v34, %s2901_s10  ;;  %v2788_v3 = vpop.eup %2787  ;;  %v1958_v58 = vmul.f32 %v2786_v29, %v3960_v11  ;;  %v1846_v13 = vpop.f32.mrf.mxu3  ;;  %2797 = vrcp.f32 %v3821_v56 }
 0x2ac   : > { %v1974_v0 = vmul.f32 %v2788_v3, %v1840_v5  ;;  %v2169_v63 = vsel %vm496_vm0, %v1913_v37, %v1994_v48  ;;  %2799 = vrcp.f32 %v3829_v46 }
 0x2ad   : > { %v2122_v26 = vpop.permute.xlu2 %2121  ;;  %v2790_v43 = vpop.eup %2789  ;;  %2801 = vrcp.f32 %v3843_v33 }
 0x2ae   : > { %v2792_v15 = vpop.eup %2791  ;;  %v1976_v61 = vmul.f32 %v2790_v43, %v1846_v13  ;;  %2803 = vrcp.f32 %v3849_v59 }
 0x2af   : > { %2087 = vrot.lane.b32.xlu0 %v1960_v54, %s2902_s11  ;;  %v1914_v32 = vmul.f32 %v2792_v15, %v3970_v2  ;;  %v2794_v6 = vpop.eup %2793  ;;  %2805 = vrcp.f32 %v3867_v42 }
 0x2b0   : > { %v1915_v2 = vmul.f32 %v2794_v6, %v1612_v30  ;;  %v2796_v48 = vpop.eup %2795  ;;  %2807 = vrcp.f32 %v3890_v36 }
 0x2b1   : > { %v1996_v31 = vpop.permute.xlu0 %1995  ;;  %v2798_v45 = vpop.eup %2797  ;;  %v1916_v22 = vmul.f32 %v2796_v48, %v1615_v20  ;;  %2809 = vrcp.f32 %v3902_v19 }
 0x2b2   : > { %2021 = vrot.lane.b32.xlu2 %v1943_v8, %s2901_s10  ;;  %v2170_v53 = vsel %vm496_vm0, %v1914_v32, %v1996_v31  ;;  %v1624_v5 = vpop.f32.mrf.mxu0  ;;  %v1917_v24 = vmul.f32 %v2798_v45, %v1618_v60  ;;  %v2800_v23 = vpop.eup %2799  ;;  %2811 = vrcp.f32 %v3915_v10 }
 0x2b3   : > { %2085 = vrot.lane.b32.xlu1 %v1959_v62, %s2902_s11  ;;  %v1918_v3 = vmul.f32 %v2800_v23, %v1621_v4  ;;  %2813 = vrcp.f32 %v3937_v12 }
 0x2b4   : > { %2815 = vrcp.f32 %v3973_v41 }
 0x2b5   : > { %v2060_v44 = vpop.permute.xlu2 %2059  ;;  %2817 = vrcp.f32 %v3951_v9 }
 0x2b6   : > { %v2187_v47 = vsel %vm2185_vm2, %v2170_v53, %v2060_v44  ;;  %2819 = vrcp.f32 %v3942_v57 }
 0x2b7   : > { %2149 = vrot.lane.b32.xlu0 %v1975_v52, %s2903_s18  ;;  %v2802_v52 = vpop.eup %2801 }
 0x2b9   : > { %v2058_v18 = vpop.permute.xlu0 %2057 }
 0x2ba   : > { %2083 = vrot.lane.b32.xlu2 %v1958_v58, %s2902_s11  ;;  %v2186_v14 = vsel %vm2185_vm2, %v2169_v63, %v2058_v18  ;;  %v1627_v40 = vpop.f32.mrf.mxu0  ;;  %v2804_v18 = vpop.eup %2803 }
 0x2bb   : > { %2147 = vrot.lane.b32.xlu1 %v1974_v0, %s2903_s18  ;;  %v2203_v1 = vsel %vm2202_vm1, %v2186_v14, %v2122_v26  ;;  %v1919_v14 = vmul.f32 %v2802_v52, %v1624_v5 }
 0x2bc   : > { %2219 = vst [vmem:[%s3994_s23] sm:$0xff] %v2203_v1  ;;  %v1920_v1 = vmul.f32 %v2804_v18, %v1627_v40 }
 0x2bd   : > { %v2000_v55 = vpop.permute.xlu2 %1999  ;;  %v1998_v11 = vpop.permute.xlu1 %1997 }
 0x2be   : > { %v2171_v51 = vsel %vm496_vm0, %v1915_v2, %v1998_v11  ;;  %v2172_v16 = vsel %vm496_vm0, %v1916_v22, %v2000_v55 }
 0x2c1   : > { %v2126_v25 = vpop.permute.xlu0 %2125 }
 0x2c2   : > { %2151 = vrot.lane.b32.xlu2 %v1976_v61, %s2903_s18  ;;  %v1630_v20 = vpop.f32.mrf.mxu0 }
 0x2c5   : > { %v2128_v35 = vpop.permute.xlu2 %2127  ;;  %v2124_v28 = vpop.permute.xlu1 %2123 }
 0x2c6   : > { %v2204_v21 = vsel %vm2202_vm1, %v2187_v47, %v2124_v28  ;;  %v2806_v28 = vpop.eup %2805 }
 0x2c7   : > { %2220 = vst [vmem:[%s3994_s23 + $0x8] sm:$0xff] %v2204_v21  ;;  %v1921_v6 = vmul.f32 %v2806_v28, %v1630_v20  ;;  %v2808_v4 = vpop.eup %2807 }
 0x2c9   : > { %v2002_v38 = vpop.permute.xlu0 %2001 }
 0x2ca   : > { %v2173_v30 = vsel %vm496_vm0, %v1917_v24, %v2002_v38  ;;  %v1633_v55 = vpop.f32.mrf.mxu0 }
 0x2cd   : > { %v2004_v27 = vpop.permute.xlu2 %2003  ;;  %v2062_v7 = vpop.permute.xlu1 %2061 }
 0x2ce   : > { %v2188_v39 = vsel %vm2185_vm2, %v2171_v51, %v2062_v7  ;;  %v2174_v37 = vsel %vm496_vm0, %v1918_v3, %v2004_v27  ;;  %v2810_v7 = vpop.eup %2809 }
 0x2cf   : > { %v2205_v34 = vsel %vm2202_vm1, %v2188_v39, %v2126_v25  ;;  %v1922_v39 = vmul.f32 %v2808_v4, %v1633_v55 }
 0x2d0   : > { %2221 = vst [vmem:[%s3994_s23 + $0x10] sm:$0xff] %v2205_v34 }
 0x2d1   : > { %v2064_v56 = vpop.permute.xlu0 %2063 }
 0x2d2   : > { %v2189_v26 = vsel %vm2185_vm2, %v2172_v16, %v2064_v56  ;;  %v1636_v53 = vpop.f32.mrf.mxu0 }
 0x2d3   : > { %v2206_v17 = vsel %vm2202_vm1, %v2189_v26, %v2128_v35  ;;  %v1923_v34 = vmul.f32 %v2810_v7, %v1636_v53 }
 0x2d4   : > { %2222 = vst [vmem:[%s3994_s23 + $0x18] sm:$0xff] %v2206_v17 }
 0x2d5   : > { %v2066_v54 = vpop.permute.xlu2 %2065  ;;  %v2130_v8 = vpop.permute.xlu1 %2129 }
 0x2d6   : > { %v2190_v62 = vsel %vm2185_vm2, %v2173_v30, %v2066_v54 }
 0x2d7   : > { %v2207_v31 = vsel %vm2202_vm1, %v2190_v62, %v2130_v8 }
 0x2d8   : > { %2223 = vst [vmem:[%s3994_s23 + $0x20] sm:$0xff] %v2207_v31  ;;  %v2812_v31 = vpop.eup %2811 }
 0x2d9   : > { %v2132_v49 = vpop.permute.xlu0 %2131 }
 0x2da   : > { %v1639_v51 = vpop.f32.mrf.mxu0 }
 0x2dd   : > { %v2134_v50 = vpop.permute.xlu2 %2133  ;;  %v2006_v29 = vpop.permute.xlu1 %2005 }
 0x2de   : > { %v2175_v33 = vsel %vm496_vm0, %v1919_v14, %v2006_v29 }
 0x2e1   : > { %v2008_v44 = vpop.permute.xlu0 %2007 }
 0x2e2   : > { %v2176_v15 = vsel %vm496_vm0, %v1920_v1, %v2008_v44  ;;  %v1642_v26 = vpop.f32.mrf.mxu0 }
 0x2e5   : > { %v2010_v58 = vpop.permute.xlu2 %2009  ;;  %v2068_v0 = vpop.permute.xlu1 %2067 }
 0x2e6   : > { %v2191_v46 = vsel %vm2185_vm2, %v2174_v37, %v2068_v0  ;;  %v2177_v38 = vsel %vm496_vm0, %v1921_v6, %v2010_v58 }
 0x2e7   : > { %v2208_v63 = vsel %vm2202_vm1, %v2191_v46, %v2132_v49  ;;  %v1924_v49 = vmul.f32 %v2812_v31, %v1639_v51 }
 0x2e8   : > { %2224 = vst [vmem:[%s3994_s23 + $0x28] sm:$0xff] %v2208_v63 }
 0x2e9   : > { %v2070_v59 = vpop.permute.xlu0 %2069 }
 0x2ea   : > { %v2192_v43 = vsel %vm2185_vm2, %v2175_v33, %v2070_v59  ;;  %v1645_v62 = vpop.f32.mrf.mxu0 }
 0x2eb   : > { %v2209_v11 = vsel %vm2202_vm1, %v2192_v43, %v2134_v50  ;;  %v2814_v50 = vpop.eup %2813 }
 0x2ec   : > { %2225 = vst [vmem:[%s3994_s23 + $0x30] sm:$0xff] %v2209_v11  ;;  %v1925_v20 = vmul.f32 %v2814_v50, %v1642_v26  ;;  %v2816_v18 = vpop.eup %2815 }
 0x2ed   : > { %v2072_v13 = vpop.permute.xlu2 %2071  ;;  %v2136_v60 = vpop.permute.xlu1 %2135 }
 0x2ee   : > { %v2193_v61 = vsel %vm2185_vm2, %v2176_v15, %v2072_v13  ;;  %v2818_v59 = vpop.eup %2817 }
 0x2ef   : > { %v2210_v32 = vsel %vm2202_vm1, %v2193_v61, %v2136_v60  ;;  %v2820_v9 = vpop.eup %2819 }
 0x2f0   : > { %2226 = vst [vmem:[%s3994_s23 + $0x38] sm:$0xff] %v2210_v32  ;;  %v1926_v60 = vmul.f32 %v2820_v9, %v1645_v62 }
 0x2f1   : > { %v2138_v25 = vpop.permute.xlu0 %2137 }
 0x2f2   : > { %v1648_v52 = vpop.f32.mrf.mxu0 }
 0x2f3   : > { %v1927_v13 = vmul.f32 %v2818_v59, %v1648_v52 }
 0x2f5   : > { %v2140_v47 = vpop.permute.xlu2 %2139  ;;  %v2012_v35 = vpop.permute.xlu1 %2011 }
 0x2f6   : > { %v2178_v36 = vsel %vm496_vm0, %v1922_v39, %v2012_v35 }
 0x2f9   : > { %v2014_v21 = vpop.permute.xlu0 %2013 }
 0x2fa   : > { %v2179_v5 = vsel %vm496_vm0, %v1923_v34, %v2014_v21  ;;  %v1651_v14 = vpop.f32.mrf.mxu0 }
 0x2fb   : > { %v1928_v33 = vmul.f32 %v2816_v18, %v1651_v14 }
 0x2fd   : > { %v2016_v2 = vpop.permute.xlu2 %2015  ;;  %v2074_v48 = vpop.permute.xlu1 %2073 }
 0x2fe   : > { %v2194_v42 = vsel %vm2185_vm2, %v2177_v38, %v2074_v48  ;;  %v2180_v29 = vsel %vm496_vm0, %v1924_v49, %v2016_v2 }
 0x2ff   : > { %v2211_v27 = vsel %vm2202_vm1, %v2194_v42, %v2138_v25 }
 0x300   : > { %2227 = vst [vmem:[%s3994_s23 + $0x40] sm:$0xff] %v2211_v27 }
 0x301   : > { %v2076_v19 = vpop.permute.xlu0 %2075 }
 0x302   : > { %v2195_v45 = vsel %vm2185_vm2, %v2178_v36, %v2076_v19 }
 0x303   : > { %v2212_v22 = vsel %vm2202_vm1, %v2195_v45, %v2140_v47 }
 0x304   : > { %2228 = vst [vmem:[%s3994_s23 + $0x48] sm:$0xff] %v2212_v22 }
 0x305   : > { %v2078_v16 = vpop.permute.xlu2 %2077  ;;  %v2142_v56 = vpop.permute.xlu1 %2141 }
 0x306   : > { %v2196_v24 = vsel %vm2185_vm2, %v2179_v5, %v2078_v16 }
 0x307   : > { %v2213_v17 = vsel %vm2202_vm1, %v2196_v24, %v2142_v56 }
 0x308   : > { %2229 = vst [vmem:[%s3994_s23 + $0x50] sm:$0xff] %v2213_v17 }
 0x309   : > { %v2144_v30 = vpop.permute.xlu0 %2143 }
 0x30d   : > { %v2146_v54 = vpop.permute.xlu2 %2145  ;;  %v2018_v8 = vpop.permute.xlu1 %2017 }
 0x30e   : > { %v2181_v12 = vsel %vm496_vm0, %v1925_v20, %v2018_v8 }
 0x311   : > { %v2020_v40 = vpop.permute.xlu0 %2019 }
 0x312   : > { %v2182_v53 = vsel %vm496_vm0, %v1926_v60, %v2020_v40 }
 0x315   : > { %v2022_v23 = vpop.permute.xlu2 %2021  ;;  %v2080_v44 = vpop.permute.xlu1 %2079 }
 0x316   : > { %v2197_v3 = vsel %vm2185_vm2, %v2180_v29, %v2080_v44  ;;  %v2183_v57 = vsel %vm496_vm0, %v1927_v13, %v2022_v23 }
 0x317   : > { %v2214_v10 = vsel %vm2202_vm1, %v2197_v3, %v2144_v30 }
 0x318   : > { %2230 = vst [vmem:[%s3994_s23 + $0x58] sm:$0xff] %v2214_v10 }
 0x319   : > { %v2082_v37 = vpop.permute.xlu0 %2081 }
 0x31a   : > { %v2198_v58 = vsel %vm2185_vm2, %v2181_v12, %v2082_v37 }
 0x31b   : > { %v2215_v0 = vsel %vm2202_vm1, %v2198_v58, %v2146_v54 }
 0x31c   : > { %2231 = vst [vmem:[%s3994_s23 + $0x60] sm:$0xff] %v2215_v0 }
 0x31d   : > { %v2084_v46 = vpop.permute.xlu2 %2083  ;;  %v2024_v63 = vpop.permute.xlu1 %2023 }
 0x31e   : > { %v2184_v1 = vsel %vm496_vm0, %v1928_v33, %v2024_v63  ;;  %v2199_v47 = vsel %vm2185_vm2, %v2182_v53, %v2084_v46 }
 0x321   : > { %v2088_v41 = vpop.permute.xlu0 %2087 }
 0x322   : > { %v2201_v43 = vsel %vm2185_vm2, %v2184_v1, %v2088_v41 }
 0x325   : > { %v2086_v55 = vpop.permute.xlu1 %2085  ;;  %v2152_v11 = vpop.permute.xlu2 %2151 }
 0x326   : > { %v2218_v15 = vsel %vm2202_vm1, %v2201_v43, %v2152_v11  ;;  %v2200_v61 = vsel %vm2185_vm2, %v2183_v57, %v2086_v55 }
 0x327   : > { %2234 = vst [vmem:[%s3994_s23 + $0x78] sm:$0xff] %v2218_v15 }
 0x329   : > { %v2150_v32 = vpop.permute.xlu0 %2149 }
 0x32a   : > { %v2217_v25 = vsel %vm2202_vm1, %v2200_v61, %v2150_v32 }
 0x32b   : > { %2233 = vst [vmem:[%s3994_s23 + $0x70] sm:$0xff] %v2217_v25 }
 0x32d   : > { %v2148_v35 = vpop.permute.xlu1 %2147 }
 0x32e   : > { %v2216_v28 = vsel %vm2202_vm1, %v2199_v47, %v2148_v35 }
 0x32f   : > { %2232 = vst [vmem:[%s3994_s23 + $0x68] sm:$0xff] %v2216_v28 }
 0x330   : > { %2848 = shalt.err (!%p2845_p5)
}
 0x331   : > { %s2904_s18 = smov 128   ;;  %s2905_s19 = smov 8  }
 0x332   : > { %2505 = dma.vmem_to_hbm [thread:$0]  (%p2966_p4), %s2251_s15, 2048, %s2253_s30, %s2236_s4, %s2904_s18, %s2904_s18, %s2905_s19  }
 0x333 PF: > { %p2511_p6 = scmp.ge.s32.totalorder %s2899_s17, 2  ;;  %s2267_s21 = sand.u32 1, %s2879_s12  }
 0x334   : > { %s2268_s23 = scalar_lea.sflag [#allocation3], %s2267_s21 }
 0x335   : > { %p2508_p7 = pnand %p2511_p6, %p2973_p8 }
 0x337   : > { %p2509_p9 = pneg %p2508_p7 }
 0x339   : > { %2874 = dma.done.wait (%p2509_p9), %s2268_s23, 2048  }
 0x33a   : > { %2876 = vsyncadd (%p2509_p9), %s2268_s23, 4294965248  ;;  %s16_s17 = sadd.s32 1, %s2899_s17   ;;  %s4142_s12 = smov %s2883_s13 }
 0x33b   : > { %p13_p10 = scmp.ge.s32.totalorder %s16_s17, 4   ;;  %s4143_s13 = smov %s2887_s14 }
 0x33c   : > { %s4144_s14 = smov %s2979_s25  ;;  %s4145_s15 = smov %s2895_s16 }
 0x33d   : > { %s4146_s16 = smov %s4148_s20  ;;  %15 = sbr.rel (!%p13_p10) target bundleno = 4 (0x4), region = 73 }
 0x342   :  { %2274 = vsyncpa [#allocation3], 1 }
 0x343   :  { %2276 = vsyncpa [#allocation3 + $0x1], 1 }

</bundles_post_ra>
